<compile_context>
chip_gen: v7x
topology: tpu7x:2x2x1
jax: 0.10.0
libtpu: 0.0.40
codegen_flags: <defaults>
</compile_context>

<pallas_src>
import functools

import numpy as np
import jax
import jax.numpy as jnp
from jax.experimental import pallas as pl
from jax.experimental.pallas import tpu as pltpu

DILATIONS = (6, 12, 18, 24)
KSIZE = 3


def _assp_kernel(x_ref, w_ref, b_ref, mask_ref, o_ref, xf_ref, slab_ref, *,
                 hw, w_dim, off, taps, dw_index):
    """Summed dilated 3x3 convs for one batch element.

    x_ref   : (1, Cin, H*W)   flattened NCHW input tile (unpadded)
    w_ref   : (Cout, K)       fused weights, K = n_taps * Cin
    b_ref   : (Cout, 1)       summed per-branch biases
    mask_ref: (n_dw, H*W)     column-validity masks per distinct dw shift
    o_ref   : (1, Cout, H*W)  lane-dense NCHW output tile
    xf_ref  : (Cin, L)        zero-halo flat-image scratch
    slab_ref: (K, H*W)        im2col slab scratch
    """
    cin = x_ref.shape[1]
    L = xf_ref.shape[1]

    # Stage the image into the zero-halo scratch. The halo is the implicit
    # zero padding for row-out-of-bounds taps and is never fetched from HBM.
    xf_ref[:, :off] = jnp.zeros((cin, off), xf_ref.dtype)
    xf_ref[:, off + hw:] = jnp.zeros((cin, L - off - hw), xf_ref.dtype)
    xf_ref[:, off:off + hw] = x_ref[0]

    # Build the (K, H*W) im2col slab: one static lane-shifted slice per tap,
    # column-masked where the tap's dw shift crosses the image border.
    for t, (dh, dw) in enumerate(taps):
        start = off + dh * w_dim + dw                      # static offset
        piece = xf_ref[:, start:start + hw]                # (Cin, H*W)
        if dw != 0:
            idx = dw_index[dw]
            piece = piece * mask_ref[idx:idx + 1, :]       # (1, H*W) broadcast
        slab_ref[t * cin:(t + 1) * cin, :] = piece

    # Single fused matmul over K = n_taps * Cin (f32 accumulation) + bias.
    out = jax.lax.dot_general(
        w_ref[...], slab_ref[...],
        (((1,), (0,)), ((), ())),
        preferred_element_type=jnp.float32,
    )                                                      # (Cout, H*W)
    out = out + b_ref[...]
    o_ref[0] = out.astype(o_ref.dtype)


def assp_forward(x_nchw, weights, biases, dilations=DILATIONS):
    """weights: list of (Cout, Cin, 3, 3) PyTorch OIHW; biases: list of (Cout,)."""
    N, Cin, H, W = x_nchw.shape
    HW = H * W
    Cout = weights[0].shape[0]
    n_taps = len(dilations) * KSIZE * KSIZE
    K = n_taps * Cin

    # Flattened NCHW input (contiguous reshape, no transpose, no host padding).
    x_flat = x_nchw.reshape(N, Cin, HW)

    # Fused weight matrix (Cout, K); column order = (branch, kh, kw, cin),
    # matching the slab row order built inside the kernel.
    w_fused = jnp.concatenate(
        [jnp.transpose(w, (2, 3, 1, 0)).reshape(KSIZE * KSIZE * Cin, Cout)
         for w in weights], axis=0).T                       # (Cout, K)
    bias_total = functools.reduce(lambda a, b: a + b, biases)
    bias_total = bias_total.reshape(Cout, 1).astype(jnp.float32)

    # Static tap offsets (dh, dw), branch-major, then kh, kw.
    taps = tuple(((kh - 1) * d, (kw - 1) * d)
                 for d in dilations for kh in range(KSIZE) for kw in range(KSIZE))

    # Column-validity masks, one row per distinct nonzero dw shift.
    dw_vals = sorted({dw for (_, dw) in taps if dw != 0})
    if not dw_vals:
        dw_vals = [0]
    dw_index = {dw: i for i, dw in enumerate(dw_vals)}
    col = np.arange(HW) % W
    mask_np = np.stack(
        [((col >= -dw) & (col <= W - 1 - dw)) for dw in dw_vals]).astype(np.float32)
    masks = jnp.asarray(mask_np, dtype=x_nchw.dtype)        # (n_dw, HW)

    # Zero-halo geometry: halo must cover the largest flat shift |dh*W + dw|.
    shift_max = max(abs(dh) * W + abs(dw) for (dh, dw) in taps)
    off = ((shift_max + 127) // 128) * 128                  # lane-aligned centre
    L = 2 * off + HW

    kernel = functools.partial(_assp_kernel, hw=HW, w_dim=W, off=off,
                               taps=taps, dw_index=dw_index)

    out_flat = pl.pallas_call(
        kernel,
        out_shape=jax.ShapeDtypeStruct((N, Cout, HW), x_nchw.dtype),
        grid_spec=pltpu.PrefetchScalarGridSpec(
            num_scalar_prefetch=0,
            grid=(N,),
            in_specs=[
                pl.BlockSpec((1, Cin, HW), lambda n: (n, 0, 0)),
                pl.BlockSpec((Cout, K), lambda n: (0, 0)),
                pl.BlockSpec((Cout, 1), lambda n: (0, 0)),
                pl.BlockSpec((len(dw_vals), HW), lambda n: (0, 0)),
            ],
            out_specs=pl.BlockSpec((1, Cout, HW), lambda n: (n, 0, 0)),
            scratch_shapes=[
                pltpu.VMEM((Cin, L), x_nchw.dtype),          # zero-halo image
                pltpu.VMEM((K, HW), x_nchw.dtype),           # im2col slab
            ],
        ),
        compiler_params=pltpu.CompilerParams(
            dimension_semantics=("parallel",),
            vmem_limit_bytes=32 * 1024 * 1024,
        ),
    )(x_flat, w_fused, bias_total, masks)

    return out_flat.reshape(N, Cout, H, W)


def assp_ref(x_nchw, weights, biases, dilations=DILATIONS):
    """Pure-JAX reference (lax.conv_general_dilated) for correctness check."""
    x = jnp.transpose(x_nchw, (0, 2, 3, 1))
    out = None
    for w, b, d in zip(weights, biases, dilations):
        w_hwio = jnp.transpose(w, (2, 3, 1, 0))
        y = jax.lax.conv_general_dilated(
            x, w_hwio, window_strides=(1, 1),
            padding=[(d, d), (d, d)], rhs_dilation=(d, d),
            dimension_numbers=("NHWC", "HWIO", "NHWC"))
        y = y + b[None, None, None, :]
        out = y if out is None else out + y
    return jnp.transpose(out, (0, 3, 1, 2))


if __name__ == "__main__":
    # Shapes consistent with ASSP(in_channels=4, channels=8) on a
    # (2, 4, 16, 16) NCHW input.
    N, Cin, H, W = 2, 4, 16, 16
    Cout = 8

    key = jax.random.PRNGKey(0)
    kx, *kws = jax.random.split(key, 1 + 2 * len(DILATIONS))

    x = jax.random.normal(kx, (N, Cin, H, W), jnp.float32)

    weights, biases = [], []
    for i in range(len(DILATIONS)):
        weights.append(
            0.1 * jax.random.normal(kws[2 * i], (Cout, Cin, KSIZE, KSIZE), jnp.float32))
        biases.append(
            0.1 * jax.random.normal(kws[2 * i + 1], (Cout,), jnp.float32))

    out = jax.block_until_ready(assp_forward(x, weights, biases))
    ref = jax.block_until_ready(assp_ref(x, weights, biases))

    assert out.shape == (N, Cout, H, W), out.shape
    max_err = float(jnp.max(jnp.abs(out - ref)))
    assert jnp.allclose(out, ref, atol=1e-4, rtol=1e-4), max_err

    print("KERNEL_OK")
</pallas_src>

<mosaic_0001>
module attributes {stable_mosaic.version = 11 : i64} {
  func.func @_assp_kernel(%arg0: i32, %arg1: memref<1x4x256xf32, #tpu.memory_space<vmem>>, %arg2: memref<8x144xf32, #tpu.memory_space<vmem>>, %arg3: memref<8x1xf32, #tpu.memory_space<vmem>>, %arg4: memref<8x256xf32, #tpu.memory_space<vmem>>, %arg5: memref<1x8x256xf32, #tpu.memory_space<vmem>>, %arg6: memref<4x1280xf32, #tpu.memory_space<vmem>>, %arg7: memref<144x256xf32, #tpu.memory_space<vmem>>) attributes {dimension_semantics = [#tpu.dimension_semantics<parallel>], iteration_bounds = array<i64: 2>, scalar_prefetch = 0 : i64, scratch_operands = 2 : i64, tpu.core_type = #tpu.core_type<tc>, window_params = [{transform_indices = @transform_0, window_bounds = array<i64: 1, 4, 256>}, {pipeline_mode = #tpu.pipeline_mode<synchronous>, transform_indices = @transform_1, window_bounds = array<i64: 8, 144>}, {pipeline_mode = #tpu.pipeline_mode<synchronous>, transform_indices = @transform_2, window_bounds = array<i64: 8, 1>}, {pipeline_mode = #tpu.pipeline_mode<synchronous>, transform_indices = @transform_3, window_bounds = array<i64: 8, 256>}, {transform_indices = @transform_4, window_bounds = array<i64: 1, 8, 256>}]} {
    %cst = arith.constant 0.000000e+00 : f32
    %0 = vector.broadcast %cst : f32 to vector<4x512xf32>
    %c0 = arith.constant 0 : index
    %c0_0 = arith.constant 0 : index
    %1 = vector.load %arg6[%c0, %c0_0] : memref<4x1280xf32, #tpu.memory_space<vmem>>, vector<4x512xf32>
    tpu.vector_store %arg6[%c0, %c0_0], %0 {strides = array<i32>} : memref<4x1280xf32, #tpu.memory_space<vmem>>, vector<4x512xf32>,
    %cst_1 = arith.constant 0.000000e+00 : f32
    %2 = vector.broadcast %cst_1 : f32 to vector<4x512xf32>
    %c0_2 = arith.constant 0 : index
    %c768 = arith.constant 768 : index
    %3 = vector.load %arg6[%c0_2, %c768] : memref<4x1280xf32, #tpu.memory_space<vmem>>, vector<4x512xf32>
    tpu.vector_store %arg6[%c0_2, %c768], %2 {strides = array<i32>} : memref<4x1280xf32, #tpu.memory_space<vmem>>, vector<4x512xf32>,
    %c0_3 = arith.constant 0 : index
    %c0_4 = arith.constant 0 : index
    %c0_5 = arith.constant 0 : index
    %4 = vector.load %arg1[%c0_3, %c0_4, %c0_5] : memref<1x4x256xf32, #tpu.memory_space<vmem>>, vector<1x4x256xf32>
    %5 = vector.shape_cast %4 : vector<1x4x256xf32> to vector<4x256xf32>
    %c0_6 = arith.constant 0 : index
    %c512 = arith.constant 512 : index
    %6 = vector.load %arg6[%c0_6, %c512] : memref<4x1280xf32, #tpu.memory_space<vmem>>, vector<4x256xf32>
    tpu.vector_store %arg6[%c0_6, %c512], %5 {strides = array<i32>} : memref<4x1280xf32, #tpu.memory_space<vmem>>, vector<4x256xf32>,
    %c0_7 = arith.constant 0 : index
    %c410 = arith.constant 410 : index
    %7 = vector.load %arg6[%c0_7, %c410] : memref<4x1280xf32, #tpu.memory_space<vmem>>, vector<4x256xf32>
    %c3 = arith.constant 3 : index
    %c0_8 = arith.constant 0 : index
    %8 = vector.load %arg4[%c3, %c0_8] : memref<8x256xf32, #tpu.memory_space<vmem>>, vector<1x256xf32>
    %9 = vector.broadcast %8 : vector<1x256xf32> to vector<4x256xf32>
    %10 = arith.mulf %7, %9 : vector<4x256xf32>
    %c0_9 = arith.constant 0 : index
    %c0_10 = arith.constant 0 : index
    %11 = vector.load %arg7[%c0_9, %c0_10] : memref<144x256xf32, #tpu.memory_space<vmem>>, vector<4x256xf32>
    tpu.vector_store %arg7[%c0_9, %c0_10], %10 {strides = array<i32>} : memref<144x256xf32, #tpu.memory_space<vmem>>, vector<4x256xf32>,
    %c0_11 = arith.constant 0 : index
    %c416 = arith.constant 416 : index
    %12 = vector.load %arg6[%c0_11, %c416] : memref<4x1280xf32, #tpu.memory_space<vmem>>, vector<4x256xf32>
    %c4 = arith.constant 4 : index
    %c0_12 = arith.constant 0 : index
    %13 = vector.load %arg7[%c4, %c0_12] : memref<144x256xf32, #tpu.memory_space<vmem>>, vector<4x256xf32>
    tpu.vector_store %arg7[%c4, %c0_12], %12 {strides = array<i32>} : memref<144x256xf32, #tpu.memory_space<vmem>>, vector<4x256xf32>,
    %c0_13 = arith.constant 0 : index
    %c422 = arith.constant 422 : index
    %14 = vector.load %arg6[%c0_13, %c422] : memref<4x1280xf32, #tpu.memory_space<vmem>>, vector<4x256xf32>
    %c4_14 = arith.constant 4 : index
    %c0_15 = arith.constant 0 : index
    %15 = vector.load %arg4[%c4_14, %c0_15] : memref<8x256xf32, #tpu.memory_space<vmem>>, vector<1x256xf32>
    %16 = vector.broadcast %15 : vector<1x256xf32> to vector<4x256xf32>
    %17 = arith.mulf %14, %16 : vector<4x256xf32>
    %c8 = arith.constant 8 : index
    %c0_16 = arith.constant 0 : index
    %18 = vector.load %arg7[%c8, %c0_16] : memref<144x256xf32, #tpu.memory_space<vmem>>, vector<4x256xf32>
    tpu.vector_store %arg7[%c8, %c0_16], %17 {strides = array<i32>} : memref<144x256xf32, #tpu.memory_space<vmem>>, vector<4x256xf32>,
    %c0_17 = arith.constant 0 : index
    %c506 = arith.constant 506 : index
    %19 = vector.load %arg6[%c0_17, %c506] : memref<4x1280xf32, #tpu.memory_space<vmem>>, vector<4x256xf32>
    %c3_18 = arith.constant 3 : index
    %c0_19 = arith.constant 0 : index
    %20 = vector.load %arg4[%c3_18, %c0_19] : memref<8x256xf32, #tpu.memory_space<vmem>>, vector<1x256xf32>
    %21 = vector.broadcast %20 : vector<1x256xf32> to vector<4x256xf32>
    %22 = arith.mulf %19, %21 : vector<4x256xf32>
    %c12 = arith.constant 12 : index
    %c0_20 = arith.constant 0 : index
    %23 = vector.load %arg7[%c12, %c0_20] : memref<144x256xf32, #tpu.memory_space<vmem>>, vector<4x256xf32>
    tpu.vector_store %arg7[%c12, %c0_20], %22 {strides = array<i32>} : memref<144x256xf32, #tpu.memory_space<vmem>>, vector<4x256xf32>,
    %c0_21 = arith.constant 0 : index
    %c512_22 = arith.constant 512 : index
    %24 = vector.load %arg6[%c0_21, %c512_22] : memref<4x1280xf32, #tpu.memory_space<vmem>>, vector<4x256xf32>
    %c16 = arith.constant 16 : index
    %c0_23 = arith.constant 0 : index
    %25 = vector.load %arg7[%c16, %c0_23] : memref<144x256xf32, #tpu.memory_space<vmem>>, vector<4x256xf32>
    tpu.vector_store %arg7[%c16, %c0_23], %24 {strides = array<i32>} : memref<144x256xf32, #tpu.memory_space<vmem>>, vector<4x256xf32>,
    %c0_24 = arith.constant 0 : index
    %c518 = arith.constant 518 : index
    %26 = vector.load %arg6[%c0_24, %c518] : memref<4x1280xf32, #tpu.memory_space<vmem>>, vector<4x256xf32>
    %c4_25 = arith.constant 4 : index
    %c0_26 = arith.constant 0 : index
    %27 = vector.load %arg4[%c4_25, %c0_26] : memref<8x256xf32, #tpu.memory_space<vmem>>, vector<1x256xf32>
    %28 = vector.broadcast %27 : vector<1x256xf32> to vector<4x256xf32>
    %29 = arith.mulf %26, %28 : vector<4x256xf32>
    %c20 = arith.constant 20 : index
    %c0_27 = arith.constant 0 : index
    %30 = vector.load %arg7[%c20, %c0_27] : memref<144x256xf32, #tpu.memory_space<vmem>>, vector<4x256xf32>
    tpu.vector_store %arg7[%c20, %c0_27], %29 {strides = array<i32>} : memref<144x256xf32, #tpu.memory_space<vmem>>, vector<4x256xf32>,
    %c0_28 = arith.constant 0 : index
    %c602 = arith.constant 602 : index
    %31 = vector.load %arg6[%c0_28, %c602] : memref<4x1280xf32, #tpu.memory_space<vmem>>, vector<4x256xf32>
    %c3_29 = arith.constant 3 : index
    %c0_30 = arith.constant 0 : index
    %32 = vector.load %arg4[%c3_29, %c0_30] : memref<8x256xf32, #tpu.memory_space<vmem>>, vector<1x256xf32>
    %33 = vector.broadcast %32 : vector<1x256xf32> to vector<4x256xf32>
    %34 = arith.mulf %31, %33 : vector<4x256xf32>
    %c24 = arith.constant 24 : index
    %c0_31 = arith.constant 0 : index
    %35 = vector.load %arg7[%c24, %c0_31] : memref<144x256xf32, #tpu.memory_space<vmem>>, vector<4x256xf32>
    tpu.vector_store %arg7[%c24, %c0_31], %34 {strides = array<i32>} : memref<144x256xf32, #tpu.memory_space<vmem>>, vector<4x256xf32>,
    %c0_32 = arith.constant 0 : index
    %c608 = arith.constant 608 : index
    %36 = vector.load %arg6[%c0_32, %c608] : memref<4x1280xf32, #tpu.memory_space<vmem>>, vector<4x256xf32>
    %c28 = arith.constant 28 : index
    %c0_33 = arith.constant 0 : index
    %37 = vector.load %arg7[%c28, %c0_33] : memref<144x256xf32, #tpu.memory_space<vmem>>, vector<4x256xf32>
    tpu.vector_store %arg7[%c28, %c0_33], %36 {strides = array<i32>} : memref<144x256xf32, #tpu.memory_space<vmem>>, vector<4x256xf32>,
    %c0_34 = arith.constant 0 : index
    %c614 = arith.constant 614 : index
    %38 = vector.load %arg6[%c0_34, %c614] : memref<4x1280xf32, #tpu.memory_space<vmem>>, vector<4x256xf32>
    %c4_35 = arith.constant 4 : index
    %c0_36 = arith.constant 0 : index
    %39 = vector.load %arg4[%c4_35, %c0_36] : memref<8x256xf32, #tpu.memory_space<vmem>>, vector<1x256xf32>
    %40 = vector.broadcast %39 : vector<1x256xf32> to vector<4x256xf32>
    %41 = arith.mulf %38, %40 : vector<4x256xf32>
    %c32 = arith.constant 32 : index
    %c0_37 = arith.constant 0 : index
    %42 = vector.load %arg7[%c32, %c0_37] : memref<144x256xf32, #tpu.memory_space<vmem>>, vector<4x256xf32>
    tpu.vector_store %arg7[%c32, %c0_37], %41 {strides = array<i32>} : memref<144x256xf32, #tpu.memory_space<vmem>>, vector<4x256xf32>,
    %c0_38 = arith.constant 0 : index
    %c308 = arith.constant 308 : index
    %43 = vector.load %arg6[%c0_38, %c308] : memref<4x1280xf32, #tpu.memory_space<vmem>>, vector<4x256xf32>
    %c2 = arith.constant 2 : index
    %c0_39 = arith.constant 0 : index
    %44 = vector.load %arg4[%c2, %c0_39] : memref<8x256xf32, #tpu.memory_space<vmem>>, vector<1x256xf32>
    %45 = vector.broadcast %44 : vector<1x256xf32> to vector<4x256xf32>
    %46 = arith.mulf %43, %45 : vector<4x256xf32>
    %c36 = arith.constant 36 : index
    %c0_40 = arith.constant 0 : index
    %47 = vector.load %arg7[%c36, %c0_40] : memref<144x256xf32, #tpu.memory_space<vmem>>, vector<4x256xf32>
    tpu.vector_store %arg7[%c36, %c0_40], %46 {strides = array<i32>} : memref<144x256xf32, #tpu.memory_space<vmem>>, vector<4x256xf32>,
    %c0_41 = arith.constant 0 : index
    %c320 = arith.constant 320 : index
    %48 = vector.load %arg6[%c0_41, %c320] : memref<4x1280xf32, #tpu.memory_space<vmem>>, vector<4x256xf32>
    %c40 = arith.constant 40 : index
    %c0_42 = arith.constant 0 : index
    %49 = vector.load %arg7[%c40, %c0_42] : memref<144x256xf32, #tpu.memory_space<vmem>>, vector<4x256xf32>
    tpu.vector_store %arg7[%c40, %c0_42], %48 {strides = array<i32>} : memref<144x256xf32, #tpu.memory_space<vmem>>, vector<4x256xf32>,
    %c0_43 = arith.constant 0 : index
    %c332 = arith.constant 332 : index
    %50 = vector.load %arg6[%c0_43, %c332] : memref<4x1280xf32, #tpu.memory_space<vmem>>, vector<4x256xf32>
    %c5 = arith.constant 5 : index
    %c0_44 = arith.constant 0 : index
    %51 = vector.load %arg4[%c5, %c0_44] : memref<8x256xf32, #tpu.memory_space<vmem>>, vector<1x256xf32>
    %52 = vector.broadcast %51 : vector<1x256xf32> to vector<4x256xf32>
    %53 = arith.mulf %50, %52 : vector<4x256xf32>
    %c44 = arith.constant 44 : index
    %c0_45 = arith.constant 0 : index
    %54 = vector.load %arg7[%c44, %c0_45] : memref<144x256xf32, #tpu.memory_space<vmem>>, vector<4x256xf32>
    tpu.vector_store %arg7[%c44, %c0_45], %53 {strides = array<i32>} : memref<144x256xf32, #tpu.memory_space<vmem>>, vector<4x256xf32>,
    %c0_46 = arith.constant 0 : index
    %c500 = arith.constant 500 : index
    %55 = vector.load %arg6[%c0_46, %c500] : memref<4x1280xf32, #tpu.memory_space<vmem>>, vector<4x256xf32>
    %c2_47 = arith.constant 2 : index
    %c0_48 = arith.constant 0 : index
    %56 = vector.load %arg4[%c2_47, %c0_48] : memref<8x256xf32, #tpu.memory_space<vmem>>, vector<1x256xf32>
    %57 = vector.broadcast %56 : vector<1x256xf32> to vector<4x256xf32>
    %58 = arith.mulf %55, %57 : vector<4x256xf32>
    %c48 = arith.constant 48 : index
    %c0_49 = arith.constant 0 : index
    %59 = vector.load %arg7[%c48, %c0_49] : memref<144x256xf32, #tpu.memory_space<vmem>>, vector<4x256xf32>
    tpu.vector_store %arg7[%c48, %c0_49], %58 {strides = array<i32>} : memref<144x256xf32, #tpu.memory_space<vmem>>, vector<4x256xf32>,
    %c0_50 = arith.constant 0 : index
    %c512_51 = arith.constant 512 : index
    %60 = vector.load %arg6[%c0_50, %c512_51] : memref<4x1280xf32, #tpu.memory_space<vmem>>, vector<4x256xf32>
    %c52 = arith.constant 52 : index
    %c0_52 = arith.constant 0 : index
    %61 = vector.load %arg7[%c52, %c0_52] : memref<144x256xf32, #tpu.memory_space<vmem>>, vector<4x256xf32>
    tpu.vector_store %arg7[%c52, %c0_52], %60 {strides = array<i32>} : memref<144x256xf32, #tpu.memory_space<vmem>>, vector<4x256xf32>,
    %c0_53 = arith.constant 0 : index
    %c524 = arith.constant 524 : index
    %62 = vector.load %arg6[%c0_53, %c524] : memref<4x1280xf32, #tpu.memory_space<vmem>>, vector<4x256xf32>
    %c5_54 = arith.constant 5 : index
    %c0_55 = arith.constant 0 : index
    %63 = vector.load %arg4[%c5_54, %c0_55] : memref<8x256xf32, #tpu.memory_space<vmem>>, vector<1x256xf32>
    %64 = vector.broadcast %63 : vector<1x256xf32> to vector<4x256xf32>
    %65 = arith.mulf %62, %64 : vector<4x256xf32>
    %c56 = arith.constant 56 : index
    %c0_56 = arith.constant 0 : index
    %66 = vector.load %arg7[%c56, %c0_56] : memref<144x256xf32, #tpu.memory_space<vmem>>, vector<4x256xf32>
    tpu.vector_store %arg7[%c56, %c0_56], %65 {strides = array<i32>} : memref<144x256xf32, #tpu.memory_space<vmem>>, vector<4x256xf32>,
    %c0_57 = arith.constant 0 : index
    %c692 = arith.constant 692 : index
    %67 = vector.load %arg6[%c0_57, %c692] : memref<4x1280xf32, #tpu.memory_space<vmem>>, vector<4x256xf32>
    %c2_58 = arith.constant 2 : index
    %c0_59 = arith.constant 0 : index
    %68 = vector.load %arg4[%c2_58, %c0_59] : memref<8x256xf32, #tpu.memory_space<vmem>>, vector<1x256xf32>
    %69 = vector.broadcast %68 : vector<1x256xf32> to vector<4x256xf32>
    %70 = arith.mulf %67, %69 : vector<4x256xf32>
    %c60 = arith.constant 60 : index
    %c0_60 = arith.constant 0 : index
    %71 = vector.load %arg7[%c60, %c0_60] : memref<144x256xf32, #tpu.memory_space<vmem>>, vector<4x256xf32>
    tpu.vector_store %arg7[%c60, %c0_60], %70 {strides = array<i32>} : memref<144x256xf32, #tpu.memory_space<vmem>>, vector<4x256xf32>,
    %c0_61 = arith.constant 0 : index
    %c704 = arith.constant 704 : index
    %72 = vector.load %arg6[%c0_61, %c704] : memref<4x1280xf32, #tpu.memory_space<vmem>>, vector<4x256xf32>
    %c64 = arith.constant 64 : index
    %c0_62 = arith.constant 0 : index
    %73 = vector.load %arg7[%c64, %c0_62] : memref<144x256xf32, #tpu.memory_space<vmem>>, vector<4x256xf32>
    tpu.vector_store %arg7[%c64, %c0_62], %72 {strides = array<i32>} : memref<144x256xf32, #tpu.memory_space<vmem>>, vector<4x256xf32>,
    %c0_63 = arith.constant 0 : index
    %c716 = arith.constant 716 : index
    %74 = vector.load %arg6[%c0_63, %c716] : memref<4x1280xf32, #tpu.memory_space<vmem>>, vector<4x256xf32>
    %c5_64 = arith.constant 5 : index
    %c0_65 = arith.constant 0 : index
    %75 = vector.load %arg4[%c5_64, %c0_65] : memref<8x256xf32, #tpu.memory_space<vmem>>, vector<1x256xf32>
    %76 = vector.broadcast %75 : vector<1x256xf32> to vector<4x256xf32>
    %77 = arith.mulf %74, %76 : vector<4x256xf32>
    %c68 = arith.constant 68 : index
    %c0_66 = arith.constant 0 : index
    %78 = vector.load %arg7[%c68, %c0_66] : memref<144x256xf32, #tpu.memory_space<vmem>>, vector<4x256xf32>
    tpu.vector_store %arg7[%c68, %c0_66], %77 {strides = array<i32>} : memref<144x256xf32, #tpu.memory_space<vmem>>, vector<4x256xf32>,
    %c0_67 = arith.constant 0 : index
    %c206 = arith.constant 206 : index
    %79 = vector.load %arg6[%c0_67, %c206] : memref<4x1280xf32, #tpu.memory_space<vmem>>, vector<4x256xf32>
    %c1 = arith.constant 1 : index
    %c0_68 = arith.constant 0 : index
    %80 = vector.load %arg4[%c1, %c0_68] : memref<8x256xf32, #tpu.memory_space<vmem>>, vector<1x256xf32>
    %81 = vector.broadcast %80 : vector<1x256xf32> to vector<4x256xf32>
    %82 = arith.mulf %79, %81 : vector<4x256xf32>
    %c72 = arith.constant 72 : index
    %c0_69 = arith.constant 0 : index
    %83 = vector.load %arg7[%c72, %c0_69] : memref<144x256xf32, #tpu.memory_space<vmem>>, vector<4x256xf32>
    tpu.vector_store %arg7[%c72, %c0_69], %82 {strides = array<i32>} : memref<144x256xf32, #tpu.memory_space<vmem>>, vector<4x256xf32>,
    %c0_70 = arith.constant 0 : index
    %c224 = arith.constant 224 : index
    %84 = vector.load %arg6[%c0_70, %c224] : memref<4x1280xf32, #tpu.memory_space<vmem>>, vector<4x256xf32>
    %c76 = arith.constant 76 : index
    %c0_71 = arith.constant 0 : index
    %85 = vector.load %arg7[%c76, %c0_71] : memref<144x256xf32, #tpu.memory_space<vmem>>, vector<4x256xf32>
    tpu.vector_store %arg7[%c76, %c0_71], %84 {strides = array<i32>} : memref<144x256xf32, #tpu.memory_space<vmem>>, vector<4x256xf32>,
    %c0_72 = arith.constant 0 : index
    %c242 = arith.constant 242 : index
    %86 = vector.load %arg6[%c0_72, %c242] : memref<4x1280xf32, #tpu.memory_space<vmem>>, vector<4x256xf32>
    %c6 = arith.constant 6 : index
    %c0_73 = arith.constant 0 : index
    %87 = vector.load %arg4[%c6, %c0_73] : memref<8x256xf32, #tpu.memory_space<vmem>>, vector<1x256xf32>
    %88 = vector.broadcast %87 : vector<1x256xf32> to vector<4x256xf32>
    %89 = arith.mulf %86, %88 : vector<4x256xf32>
    %c80 = arith.constant 80 : index
    %c0_74 = arith.constant 0 : index
    %90 = vector.load %arg7[%c80, %c0_74] : memref<144x256xf32, #tpu.memory_space<vmem>>, vector<4x256xf32>
    tpu.vector_store %arg7[%c80, %c0_74], %89 {strides = array<i32>} : memref<144x256xf32, #tpu.memory_space<vmem>>, vector<4x256xf32>,
    %c0_75 = arith.constant 0 : index
    %c494 = arith.constant 494 : index
    %91 = vector.load %arg6[%c0_75, %c494] : memref<4x1280xf32, #tpu.memory_space<vmem>>, vector<4x256xf32>
    %c1_76 = arith.constant 1 : index
    %c0_77 = arith.constant 0 : index
    %92 = vector.load %arg4[%c1_76, %c0_77] : memref<8x256xf32, #tpu.memory_space<vmem>>, vector<1x256xf32>
    %93 = vector.broadcast %92 : vector<1x256xf32> to vector<4x256xf32>
    %94 = arith.mulf %91, %93 : vector<4x256xf32>
    %c84 = arith.constant 84 : index
    %c0_78 = arith.constant 0 : index
    %95 = vector.load %arg7[%c84, %c0_78] : memref<144x256xf32, #tpu.memory_space<vmem>>, vector<4x256xf32>
    tpu.vector_store %arg7[%c84, %c0_78], %94 {strides = array<i32>} : memref<144x256xf32, #tpu.memory_space<vmem>>, vector<4x256xf32>,
    %c0_79 = arith.constant 0 : index
    %c512_80 = arith.constant 512 : index
    %96 = vector.load %arg6[%c0_79, %c512_80] : memref<4x1280xf32, #tpu.memory_space<vmem>>, vector<4x256xf32>
    %c88 = arith.constant 88 : index
    %c0_81 = arith.constant 0 : index
    %97 = vector.load %arg7[%c88, %c0_81] : memref<144x256xf32, #tpu.memory_space<vmem>>, vector<4x256xf32>
    tpu.vector_store %arg7[%c88, %c0_81], %96 {strides = array<i32>} : memref<144x256xf32, #tpu.memory_space<vmem>>, vector<4x256xf32>,
    %c0_82 = arith.constant 0 : index
    %c530 = arith.constant 530 : index
    %98 = vector.load %arg6[%c0_82, %c530] : memref<4x1280xf32, #tpu.memory_space<vmem>>, vector<4x256xf32>
    %c6_83 = arith.constant 6 : index
    %c0_84 = arith.constant 0 : index
    %99 = vector.load %arg4[%c6_83, %c0_84] : memref<8x256xf32, #tpu.memory_space<vmem>>, vector<1x256xf32>
    %100 = vector.broadcast %99 : vector<1x256xf32> to vector<4x256xf32>
    %101 = arith.mulf %98, %100 : vector<4x256xf32>
    %c92 = arith.constant 92 : index
    %c0_85 = arith.constant 0 : index
    %102 = vector.load %arg7[%c92, %c0_85] : memref<144x256xf32, #tpu.memory_space<vmem>>, vector<4x256xf32>
    tpu.vector_store %arg7[%c92, %c0_85], %101 {strides = array<i32>} : memref<144x256xf32, #tpu.memory_space<vmem>>, vector<4x256xf32>,
    %c0_86 = arith.constant 0 : index
    %c782 = arith.constant 782 : index
    %103 = vector.load %arg6[%c0_86, %c782] : memref<4x1280xf32, #tpu.memory_space<vmem>>, vector<4x256xf32>
    %c1_87 = arith.constant 1 : index
    %c0_88 = arith.constant 0 : index
    %104 = vector.load %arg4[%c1_87, %c0_88] : memref<8x256xf32, #tpu.memory_space<vmem>>, vector<1x256xf32>
    %105 = vector.broadcast %104 : vector<1x256xf32> to vector<4x256xf32>
    %106 = arith.mulf %103, %105 : vector<4x256xf32>
    %c96 = arith.constant 96 : index
    %c0_89 = arith.constant 0 : index
    %107 = vector.load %arg7[%c96, %c0_89] : memref<144x256xf32, #tpu.memory_space<vmem>>, vector<4x256xf32>
    tpu.vector_store %arg7[%c96, %c0_89], %106 {strides = array<i32>} : memref<144x256xf32, #tpu.memory_space<vmem>>, vector<4x256xf32>,
    %c0_90 = arith.constant 0 : index
    %c800 = arith.constant 800 : index
    %108 = vector.load %arg6[%c0_90, %c800] : memref<4x1280xf32, #tpu.memory_space<vmem>>, vector<4x256xf32>
    %c100 = arith.constant 100 : index
    %c0_91 = arith.constant 0 : index
    %109 = vector.load %arg7[%c100, %c0_91] : memref<144x256xf32, #tpu.memory_space<vmem>>, vector<4x256xf32>
    tpu.vector_store %arg7[%c100, %c0_91], %108 {strides = array<i32>} : memref<144x256xf32, #tpu.memory_space<vmem>>, vector<4x256xf32>,
    %c0_92 = arith.constant 0 : index
    %c818 = arith.constant 818 : index
    %110 = vector.load %arg6[%c0_92, %c818] : memref<4x1280xf32, #tpu.memory_space<vmem>>, vector<4x256xf32>
    %c6_93 = arith.constant 6 : index
    %c0_94 = arith.constant 0 : index
    %111 = vector.load %arg4[%c6_93, %c0_94] : memref<8x256xf32, #tpu.memory_space<vmem>>, vector<1x256xf32>
    %112 = vector.broadcast %111 : vector<1x256xf32> to vector<4x256xf32>
    %113 = arith.mulf %110, %112 : vector<4x256xf32>
    %c104 = arith.constant 104 : index
    %c0_95 = arith.constant 0 : index
    %114 = vector.load %arg7[%c104, %c0_95] : memref<144x256xf32, #tpu.memory_space<vmem>>, vector<4x256xf32>
    tpu.vector_store %arg7[%c104, %c0_95], %113 {strides = array<i32>} : memref<144x256xf32, #tpu.memory_space<vmem>>, vector<4x256xf32>,
    %c0_96 = arith.constant 0 : index
    %c104_97 = arith.constant 104 : index
    %115 = vector.load %arg6[%c0_96, %c104_97] : memref<4x1280xf32, #tpu.memory_space<vmem>>, vector<4x256xf32>
    %c0_98 = arith.constant 0 : index
    %c0_99 = arith.constant 0 : index
    %116 = vector.load %arg4[%c0_98, %c0_99] : memref<8x256xf32, #tpu.memory_space<vmem>>, vector<1x256xf32>
    %117 = vector.broadcast %116 : vector<1x256xf32> to vector<4x256xf32>
    %118 = arith.mulf %115, %117 : vector<4x256xf32>
    %c108 = arith.constant 108 : index
    %c0_100 = arith.constant 0 : index
    %119 = vector.load %arg7[%c108, %c0_100] : memref<144x256xf32, #tpu.memory_space<vmem>>, vector<4x256xf32>
    tpu.vector_store %arg7[%c108, %c0_100], %118 {strides = array<i32>} : memref<144x256xf32, #tpu.memory_space<vmem>>, vector<4x256xf32>,
    %c0_101 = arith.constant 0 : index
    %c128 = arith.constant 128 : index
    %120 = vector.load %arg6[%c0_101, %c128] : memref<4x1280xf32, #tpu.memory_space<vmem>>, vector<4x256xf32>
    %c112 = arith.constant 112 : index
    %c0_102 = arith.constant 0 : index
    %121 = vector.load %arg7[%c112, %c0_102] : memref<144x256xf32, #tpu.memory_space<vmem>>, vector<4x256xf32>
    tpu.vector_store %arg7[%c112, %c0_102], %120 {strides = array<i32>} : memref<144x256xf32, #tpu.memory_space<vmem>>, vector<4x256xf32>,
    %c0_103 = arith.constant 0 : index
    %c152 = arith.constant 152 : index
    %122 = vector.load %arg6[%c0_103, %c152] : memref<4x1280xf32, #tpu.memory_space<vmem>>, vector<4x256xf32>
    %c7 = arith.constant 7 : index
    %c0_104 = arith.constant 0 : index
    %123 = vector.load %arg4[%c7, %c0_104] : memref<8x256xf32, #tpu.memory_space<vmem>>, vector<1x256xf32>
    %124 = vector.broadcast %123 : vector<1x256xf32> to vector<4x256xf32>
    %125 = arith.mulf %122, %124 : vector<4x256xf32>
    %c116 = arith.constant 116 : index
    %c0_105 = arith.constant 0 : index
    %126 = vector.load %arg7[%c116, %c0_105] : memref<144x256xf32, #tpu.memory_space<vmem>>, vector<4x256xf32>
    tpu.vector_store %arg7[%c116, %c0_105], %125 {strides = array<i32>} : memref<144x256xf32, #tpu.memory_space<vmem>>, vector<4x256xf32>,
    %c0_106 = arith.constant 0 : index
    %c488 = arith.constant 488 : index
    %127 = vector.load %arg6[%c0_106, %c488] : memref<4x1280xf32, #tpu.memory_space<vmem>>, vector<4x256xf32>
    %c0_107 = arith.constant 0 : index
    %c0_108 = arith.constant 0 : index
    %128 = vector.load %arg4[%c0_107, %c0_108] : memref<8x256xf32, #tpu.memory_space<vmem>>, vector<1x256xf32>
    %129 = vector.broadcast %128 : vector<1x256xf32> to vector<4x256xf32>
    %130 = arith.mulf %127, %129 : vector<4x256xf32>
    %c120 = arith.constant 120 : index
    %c0_109 = arith.constant 0 : index
    %131 = vector.load %arg7[%c120, %c0_109] : memref<144x256xf32, #tpu.memory_space<vmem>>, vector<4x256xf32>
    tpu.vector_store %arg7[%c120, %c0_109], %130 {strides = array<i32>} : memref<144x256xf32, #tpu.memory_space<vmem>>, vector<4x256xf32>,
    %c0_110 = arith.constant 0 : index
    %c512_111 = arith.constant 512 : index
    %132 = vector.load %arg6[%c0_110, %c512_111] : memref<4x1280xf32, #tpu.memory_space<vmem>>, vector<4x256xf32>
    %c124 = arith.constant 124 : index
    %c0_112 = arith.constant 0 : index
    %133 = vector.load %arg7[%c124, %c0_112] : memref<144x256xf32, #tpu.memory_space<vmem>>, vector<4x256xf32>
    tpu.vector_store %arg7[%c124, %c0_112], %132 {strides = array<i32>} : memref<144x256xf32, #tpu.memory_space<vmem>>, vector<4x256xf32>,
    %c0_113 = arith.constant 0 : index
    %c536 = arith.constant 536 : index
    %134 = vector.load %arg6[%c0_113, %c536] : memref<4x1280xf32, #tpu.memory_space<vmem>>, vector<4x256xf32>
    %c7_114 = arith.constant 7 : index
    %c0_115 = arith.constant 0 : index
    %135 = vector.load %arg4[%c7_114, %c0_115] : memref<8x256xf32, #tpu.memory_space<vmem>>, vector<1x256xf32>
    %136 = vector.broadcast %135 : vector<1x256xf32> to vector<4x256xf32>
    %137 = arith.mulf %134, %136 : vector<4x256xf32>
    %c128_116 = arith.constant 128 : index
    %c0_117 = arith.constant 0 : index
    %138 = vector.load %arg7[%c128_116, %c0_117] : memref<144x256xf32, #tpu.memory_space<vmem>>, vector<4x256xf32>
    tpu.vector_store %arg7[%c128_116, %c0_117], %137 {strides = array<i32>} : memref<144x256xf32, #tpu.memory_space<vmem>>, vector<4x256xf32>,
    %c0_118 = arith.constant 0 : index
    %c872 = arith.constant 872 : index
    %139 = vector.load %arg6[%c0_118, %c872] : memref<4x1280xf32, #tpu.memory_space<vmem>>, vector<4x256xf32>
    %c0_119 = arith.constant 0 : index
    %c0_120 = arith.constant 0 : index
    %140 = vector.load %arg4[%c0_119, %c0_120] : memref<8x256xf32, #tpu.memory_space<vmem>>, vector<1x256xf32>
    %141 = vector.broadcast %140 : vector<1x256xf32> to vector<4x256xf32>
    %142 = arith.mulf %139, %141 : vector<4x256xf32>
    %c132 = arith.constant 132 : index
    %c0_121 = arith.constant 0 : index
    %143 = vector.load %arg7[%c132, %c0_121] : memref<144x256xf32, #tpu.memory_space<vmem>>, vector<4x256xf32>
    tpu.vector_store %arg7[%c132, %c0_121], %142 {strides = array<i32>} : memref<144x256xf32, #tpu.memory_space<vmem>>, vector<4x256xf32>,
    %c0_122 = arith.constant 0 : index
    %c896 = arith.constant 896 : index
    %144 = vector.load %arg6[%c0_122, %c896] : memref<4x1280xf32, #tpu.memory_space<vmem>>, vector<4x256xf32>
    %c136 = arith.constant 136 : index
    %c0_123 = arith.constant 0 : index
    %145 = vector.load %arg7[%c136, %c0_123] : memref<144x256xf32, #tpu.memory_space<vmem>>, vector<4x256xf32>
    tpu.vector_store %arg7[%c136, %c0_123], %144 {strides = array<i32>} : memref<144x256xf32, #tpu.memory_space<vmem>>, vector<4x256xf32>,
    %c0_124 = arith.constant 0 : index
    %c920 = arith.constant 920 : index
    %146 = vector.load %arg6[%c0_124, %c920] : memref<4x1280xf32, #tpu.memory_space<vmem>>, vector<4x256xf32>
    %c7_125 = arith.constant 7 : index
    %c0_126 = arith.constant 0 : index
    %147 = vector.load %arg4[%c7_125, %c0_126] : memref<8x256xf32, #tpu.memory_space<vmem>>, vector<1x256xf32>
    %148 = vector.broadcast %147 : vector<1x256xf32> to vector<4x256xf32>
    %149 = arith.mulf %146, %148 : vector<4x256xf32>
    %c140 = arith.constant 140 : index
    %c0_127 = arith.constant 0 : index
    %150 = vector.load %arg7[%c140, %c0_127] : memref<144x256xf32, #tpu.memory_space<vmem>>, vector<4x256xf32>
    tpu.vector_store %arg7[%c140, %c0_127], %149 {strides = array<i32>} : memref<144x256xf32, #tpu.memory_space<vmem>>, vector<4x256xf32>,
    %c0_128 = arith.constant 0 : index
    %c0_129 = arith.constant 0 : index
    %151 = vector.load %arg2[%c0_128, %c0_129] : memref<8x144xf32, #tpu.memory_space<vmem>>, vector<8x144xf32>
    %c0_130 = arith.constant 0 : index
    %c0_131 = arith.constant 0 : index
    %152 = vector.load %arg7[%c0_130, %c0_131] : memref<144x256xf32, #tpu.memory_space<vmem>>, vector<144x256xf32>
    %cst_132 = arith.constant dense<0.000000e+00> : vector<8x256xf32>
    %153 = tpu.matmul %151, %152, %cst_132 {dimension_numbers = #tpu.dot_dimension_numbers<[1], [0], [0], [1], [0, 0, 1, 1], [], []>} : vector<8x144xf32>, vector<144x256xf32>, vector<8x256xf32> -> vector<8x256xf32>
    %c0_133 = arith.constant 0 : index
    %c0_134 = arith.constant 0 : index
    %154 = vector.load %arg3[%c0_133, %c0_134] : memref<8x1xf32, #tpu.memory_space<vmem>>, vector<8x1xf32>
    %155 = vector.broadcast %154 : vector<8x1xf32> to vector<8x256xf32>
    %156 = arith.addf %153, %155 : vector<8x256xf32>
    %c0_135 = arith.constant 0 : index
    %c0_136 = arith.constant 0 : index
    %c0_137 = arith.constant 0 : index
    %157 = vector.load %arg5[%c0_135, %c0_136, %c0_137] : memref<1x8x256xf32, #tpu.memory_space<vmem>>, vector<1x8x256xf32>
    %158 = vector.shape_cast %157 : vector<1x8x256xf32> to vector<8x256xf32>
    %159 = vector.shape_cast %156 : vector<8x256xf32> to vector<1x8x256xf32>
    tpu.vector_store %arg5[%c0_135, %c0_136, %c0_137], %159 {strides = array<i32>} : memref<1x8x256xf32, #tpu.memory_space<vmem>>, vector<1x8x256xf32>,
    return
  }
  func.func @transform_0(%arg0: i32) -> (i32, i32, i32) {
    %c0_i32 = arith.constant 0 : i32
    %c0_i32_0 = arith.constant 0 : i32
    %c0_i32_1 = arith.constant 0 : i32
    return %arg0, %c0_i32, %c0_i32_0 : i32, i32, i32
  }
  func.func @transform_1(%arg0: i32) -> (i32, i32) {
    %c0_i32 = arith.constant 0 : i32
    %c0_i32_0 = arith.constant 0 : i32
    %c0_i32_1 = arith.constant 0 : i32
    return %c0_i32, %c0_i32_0 : i32, i32
  }
  func.func @transform_2(%arg0: i32) -> (i32, i32) {
    %c0_i32 = arith.constant 0 : i32
    %c0_i32_0 = arith.constant 0 : i32
    %c0_i32_1 = arith.constant 0 : i32
    return %c0_i32, %c0_i32_0 : i32, i32
  }
  func.func @transform_3(%arg0: i32) -> (i32, i32) {
    %c0_i32 = arith.constant 0 : i32
    %c0_i32_0 = arith.constant 0 : i32
    %c0_i32_1 = arith.constant 0 : i32
    return %c0_i32, %c0_i32_0 : i32, i32
  }
  func.func @transform_4(%arg0: i32) -> (i32, i32, i32) {
    %c0_i32 = arith.constant 0 : i32
    %c0_i32_0 = arith.constant 0 : i32
    %c0_i32_1 = arith.constant 0 : i32
    return %arg0, %c0_i32, %c0_i32_0 : i32, i32, i32
  }
}

</mosaic_0001>

<bundles_post_ra>
// kernel: tpu_custom_call.1
= control target key start
LH: loop header
LB: loop body
LE: loop exit
PB: predicated region body
PF: predicated region fallthrough
CT: control target
= control target key end

     0   :  { %9 = vsyncpa [#allocation5], 0  ;;  %s2654_s0 = inlined_call_operand.hbm [shape: f32[2,4,256], index: 0, kind: input, shape index: {}]   ;;  %s2655_s1 = inlined_call_operand.hbm [shape: f32[8,144], index: 1, kind: input, shape index: {}]   ;;  %s2656_s2 = inlined_call_operand.vmem [shape: f32[8,1], index: 2, kind: input, shape index: {}]   ;;  %s2657_s3 = inlined_call_operand.vmem [shape: f32[8,256], index: 3, kind: input, shape index: {}]   ;;  %s2658_s4 = inlined_call_operand.hbm [shape: f32[2,8,256], index: 4, kind: output, shape index: {}]  }
   0x1   :  { %11 = vsyncpa [#allocation5 + $0x1], 0 }
   0x2   :  { %12 = vsyncpa [#allocation8], 0 }
   0x3   :  { %13 = vsyncpa [#allocation6], 0 }
   0x4   :  { %15 = vsyncpa [#allocation6 + $0x1], 0  ;;  %s1846_s15 = smov 0   ;;  %s1848_s16 = smov 0  }
   0x5   :  { %s1850_s17 = smov 0   ;;  %s1852_s18 = smov 0  }
   0x6 LB: > { %s1867_s19 = sadd.s32 4294967295, %s1793_s18   ;;  %s1495_s20 = sadd.s32 4294967294, %s1793_s18   ;;  %s1793_s18 = sphi %s1852_s18, %s2712_s18   ;;  %s1789_s17 = sphi %s1850_s17, %s2711_s17   ;;  %s1785_s16 = sphi %s1848_s16, %s2710_s16   ;;  %s1781_s15 = sphi %s1846_s15, %s2709_s15  }
   0x7   : > { %p41_p0 = scmp.ne.s32.totalorder %s1785_s16, %s1781_s15  ;;  %p2659_p1 = scmp.eq.s32.totalorder %s1867_s19, 0 }
   0x8   : > { %p134_p3 = scmp.eq.s32.totalorder %s1495_s20, 1  ;;  %p1496_p5 = scmp.ge.s32.totalorder %s1793_s18, 1 }
   0x9   : > { %p1876_p4 = por %p2659_p1, %p41_p0  ;;  %p141_p7 = scmp.lt.s32.totalorder %s1793_s18, 3 }
   0xa   : > { %p1881_p6 = por %p134_p3, %p41_p0  ;;  %s1795_s24 = smov [#allocation7]  }
   0xb   : > { %s2677_s21 = scalar_select %p1876_p4, 1, 0 }
   0xc   : > { %s2678_s22 = scalar_select %p1881_p6, 1, 0 }
   0xd   : > { %p1886_p8 = pnand %p1496_p5, %p141_p7  ;;  %s154_s25 = sshll.u32 %s1795_s24, 4  ;;  %s155_s25 = int_to_ptr.vmem [resolvable:$true] %s154_s25 }
   0xe   : > { %s1894_s26 = sadd.s32 1, %s1793_s18   ;;  %s28_s30 = sadd.s32 1, %s1789_s17 }
   0xf   : > { %s2679_s23 = scalar_select %p1886_p8, 1, 0 }
  0x10   : > { %p1579_p10 = pneg %p1886_p8  ;;  %s25_s28 = ssub.s32 %s1793_s18, %s1894_s26 }
  0x11   : > { %p1904_p12 = scmp.eq.s32.totalorder %s25_s28, 0  ;;  %s1665_s7 = scalar_lea.hbm %s2655_s1, 256 }
  0x12   : > { %p1898_p11 = pnand %p1579_p10, %p2659_p1  ;;  %p1666_p0 = scmp.ne.s32.totalorder %s2655_s1, %s1665_s7 }
  0x13   : > { %s2681_s29 = scalar_select %p1904_p12, 1, 0 }
  0x14   : > { %p1667_p3 = pneg %p1898_p11  ;;  %p1672_p10 = scmp.lt.u32.totalorder %s1665_s7, %s2655_s1 }
  0x16   : > { %p1668_p5 = pnand %p1667_p3, %p1666_p0 }
  0x18   : > { %p1669_p7 = pneg %p1668_p5 }
  0x1a   : > { %p1674_p9 = pnand %p1672_p10, %p1669_p7 }
  0x1c   : > { %1677 = shalt.err (!%p1674_p9)
}
  0x1d   : > { %s1678_s12 = scalar_lea.vmem %s155_s25, 256  ;;  %p1686_p6 = scmp.lt.s32.totalorder %s155_s25, %s155_s25 }
  0x1e   : > { %p1679_p1 = scmp.ne.s32.totalorder %s155_s25, %s1678_s12  ;;  %p1687_p4 = scmp.lt.s32.totalorder %s1678_s12, %s1678_s12 }
  0x20   : > { %p1681_p2 = pnand %p1679_p1, %p1667_p3  ;;  %p1688_p8 = por %p1687_p4, %p1686_p6 }
  0x22   : > { %p1682_p13 = pneg %p1681_p2 }
  0x24   : > { %p1689_p12 = pnand %p1688_p8, %p1682_p13 }
  0x26   : > { %1692 = shalt.err (!%p1689_p12)
}
  0x27   : > { %1582 = dma.hbm_to_vmem [thread:$0]  (!%p1898_p11), %s2655_s1, 256, %s155_s25, [#allocation8]  }
  0x28   : > { %p2682_p1 = scmp.ne.s32.totalorder %s2681_s29, 0  ;;  %p36_p2 = scmp.eq.s32.totalorder %s1793_s18, 0 }
  0x29   : > { %p2683_p4 = scmp.ne.s32.totalorder %s1789_s17, %s1785_s16  ;;  %p2684_p6 = scmp.eq.s32.totalorder %s1867_s19, 1 }
  0x2a   : > { %s1930_s20 = scalar_select %p2682_p1, %s1789_s17, %s28_s30  }
  0x2b   : > { %p1938_p8 = por %p2684_p6, %p2683_p4  ;;  %p1592_p9 = scmp.lt.s32.totalorder %s1793_s18, 2 }
  0x2c   : > { %s171_s27 = sand.u32 1, %s1789_s17   ;;  %p2686_p12 = pmov %p2683_p4 }
  0x2d   : > { %s1499_s28 = sshll.u32 %s171_s27, 3  ;;  %s1533_s5 = sshll.u32 %s1793_s18, 7 }
  0x2e   : > { %p37_p13 = por %p36_p2, %p2686_p12  ;;  %s1951_s25 = scalar_lea.hbm %s2654_s0, %s1533_s5 }
  0x2f   : > { %s175_s29 = scalar_lea.vmem [#allocation4], %s1499_s28  ;;  %s172_s9 = scalar_lea.sflag [#allocation5], %s171_s27 }
  0x30   : > { %s183_s30 = sshll.u32 %s175_s29, 4  ;;  %p1953_p11 = pnand %p1592_p9, %p37_p13  ;;  %s1957_s30 = int_to_ptr.vmem [resolvable:$true] %s183_s30 }
  0x31   : > { %s1693_s10 = scalar_lea.hbm %s1951_s25, 128  ;;  %s1698_s13 = scalar_lea.hbm %s2654_s0, 256 }
  0x32   : > { %p1694_p0 = scmp.ne.s32.totalorder %s1951_s25, %s1693_s10  ;;  %p1695_p3 = pneg %p1953_p11 }
  0x33   : > { %p1699_p10 = scmp.lt.u32.totalorder %s1951_s25, %s2654_s0  ;;  %p1700_p1 = scmp.lt.u32.totalorder %s1698_s13, %s1693_s10 }
  0x34   : > { %p1696_p5 = pnand %p1695_p3, %p1694_p0  ;;  %p1702_p4 = scmp.lt.u32.totalorder %s1693_s10, %s1951_s25 }
  0x35   : > { %p1701_p2 = por %p1700_p1, %p1699_p10 }
  0x36   : > { %p1697_p7 = pneg %p1696_p5 }
  0x37   : > { %p1703_p6 = por %p1702_p4, %p1701_p2 }
  0x39   : > { %p1704_p9 = pnand %p1703_p6, %p1697_p7 }
  0x3b   : > { %1707 = shalt.err (!%p1704_p9)
}
  0x3c   : > { %s1708_s27 = scalar_lea.vmem %s1957_s30, 128  ;;  %s1796_s5 = smov [#allocation4]  }
  0x3d   : > { %p1709_p12 = scmp.ne.s32.totalorder %s1957_s30, %s1708_s27  ;;  %s1713_s6 = sshll.u32 %s1796_s5, 4  ;;  %s1714_s6 = int_to_ptr.vmem [resolvable:$false] %s1713_s6 }
  0x3e   : > { %s1715_s7 = scalar_lea.vmem %s1714_s6, 256  ;;  %p1716_p5 = scmp.lt.s32.totalorder %s1957_s30, %s1714_s6 }
  0x3f   : > { %p1711_p13 = pnand %p1709_p12, %p1695_p3  ;;  %p1717_p10 = scmp.lt.s32.totalorder %s1715_s7, %s1708_s27 }
  0x41   : > { %p1712_p0 = pneg %p1711_p13  ;;  %p1718_p1 = por %p1717_p10, %p1716_p5 }
  0x43   : > { %p1719_p2 = pnand %p1718_p1, %p1712_p0 }
  0x45   : > { %1722 = shalt.err (!%p1719_p2)
}
  0x46   : > { %1586 = dma.hbm_to_vmem [thread:$0]  (!%p1953_p11), %s1951_s25, 128, %s1957_s30, %s172_s9  }
  0x47   : > { %p2688_p7 = scmp.ne.s32.totalorder %s2679_s23, 0 }
  0x48   : > { %s1987_s29 = sand.u32 (!%p2688_p7), 1, %s1785_s16   ;;  %p2689_p3 = scmp.ne.s32.totalorder (!%p2688_p7), %s2677_s21, 0 }
  0x49   : > { %192 = sbr.rel (%p2688_p7) target bundleno = 739 (0x2e3), region = 36  ;;  %s1503_s10 = sshll.u32 (!%p2688_p7), %s1987_s29, 3 }
  0x4a   : > { %s195_s11 = scalar_lea.sflag (!%p2688_p7), [#allocation5], %s1987_s29  ;;  %s1991_s12 = scalar_lea.vmem (!%p2688_p7), [#allocation4], %s1503_s10 }
  0x50   : > { %1768 = dma.done.wait (%p2689_p3), %s195_s11, 128  }
  0x51   : > { %1770 = vsyncadd (%p2689_p3), %s195_s11, 4294967168  ;;  %p2690_p11 = scmp.eq.s32.totalorder %s1867_s19, 0 }
  0x53   : > { %1772 = dma.done.wait (%p2690_p11), [#allocation8], 256   ;;  %p2691_p4 = pmov %p2690_p11 }
  0x54   : > { %v238_v0 = vlaneseq  ;;  %v1797_v1 = vmov 0.0   ;;  %v1506_v5 = vld [vmem:[%s2657_s3 + $0x3] ss:$8 sm:$0x3]  ;;  %s1798_s7 = smov 26   ;;  %s1799_s10 = smov 122  }
  0x55   : > { %1774 = vsyncadd (%p2691_p4), [#allocation8], 4294967040  ;;  %228 = vst [vmem:[#allocation2 + $0x8] sm:$0xff] %v1797_v1  ;;  %v1508_v6 = vld [vmem:[%s2657_s3 + $0x3] ss:$8 sm:$0x3] }
  0x56   : > { %227 = vst [vmem:[#allocation2] sm:$0xff] %v1797_v1  ;;  %229 = vst [vmem:[#allocation2 + $0x18] sm:$0xff] %v1797_v1  ;;  %v239_v2 = vshrl.u32 %v238_v0, 7  ;;  %v1507_v11 = vld [vmem:[%s2657_s3 + $0x4] ss:$8 sm:$0x3] }
  0x57   : > { %230 = vst [vmem:[#allocation2 + $0x20] sm:$0xff] %v1797_v1  ;;  %v1510_v12 = vld [vmem:[%s2657_s3 + $0x3] ss:$8 sm:$0x3]  ;;  %s1800_s30 = smov 38   ;;  %s1801_s8 = smov 90  }
  0x58   : > { %v2005_v3 = vsub.s32 0, %v239_v2  ;;  %v2007_v4 = vsub.s32 1, %v239_v2  ;;  %v1509_v17 = vld [vmem:[%s2657_s3 + $0x4] ss:$8 sm:$0x3]  ;;  %s1802_s28 = smov 6  }
  0x59   : > { %v1511_v18 = vld [vmem:[%s2657_s3 + $0x4] ss:$8 sm:$0x3]  ;;  %v1512_v27 = vld [vmem:[%s2657_s3 + $0x2] ss:$8 sm:$0x3] }
  0x5a   : > { %v241_v7 = vrot.slane %v1506_v5, %v2005_v3  ;;  %v245_v8 = vrot.slane %v1506_v5, %v2007_v4  ;;  %v337_v9 = vrot.slane %v1508_v6, %v2005_v3  ;;  %v341_v10 = vrot.slane %v1508_v6, %v2007_v4  ;;  %v1513_v28 = vld [vmem:[%s2657_s3 + $0x5] ss:$8 sm:$0x3]  ;;  %v1514_v36 = vld [vmem:[%s2657_s3 + $0x2] ss:$8 sm:$0x3] }
  0x5b   : > { %v299_v13 = vrot.slane %v1507_v11, %v2005_v3  ;;  %v303_v14 = vrot.slane %v1507_v11, %v2007_v4  ;;  %v419_v15 = vrot.slane %v1510_v12, %v2005_v3  ;;  %v423_v16 = vrot.slane %v1510_v12, %v2007_v4  ;;  %v2050_v32 = vld [vmem:[%s1991_s12] sm:$0xff]  ;;  %s1803_s27 = smov 102   ;;  %s1804_s23 = smov 52  }
  0x5c   : > { %v246_v19 = vcombine.low %v241_v7, %v245_v8  ;;  %v342_v20 = vcombine.low %v337_v9, %v341_v10  ;;  %v382_v22 = vrot.slane %v1509_v17, %v2005_v3  ;;  %v386_v23 = vrot.slane %v1509_v17, %v2007_v4  ;;  %232 = vst [vmem:[#allocation2 + $0x10] sm:$0xff] %v2050_v32  ;;  %v1515_v37 = vld [vmem:[%s2657_s3 + $0x5] ss:$8 sm:$0x3]  ;;  %s1805_s25 = smov 76   ;;  %s1806_s5 = smov 116  }
  0x5d   : > { %v304_v21 = vcombine.low %v299_v13, %v303_v14  ;;  %v424_v24 = vcombine.low %v419_v15, %v423_v16  ;;  %v474_v25 = vrot.slane %v1511_v18, %v2005_v3  ;;  %v478_v26 = vrot.slane %v1511_v18, %v2007_v4  ;;  %373 = vst [vmem:[#allocation3 + $0x20] sm:$0xf] %v2050_v32  ;;  %v1516_v44 = vld [vmem:[%s2657_s3 + $0x2] ss:$8 sm:$0x3]  ;;  %s1807_s6 = smov 12  }
  0x5e   : > { %247 = vrot.lane.b32.xlu0 %v246_v19, %s1798_s7  ;;  %343 = vrot.lane.b32.xlu1 %v342_v20, %s1799_s10  ;;  %v387_v29 = vcombine.low %v382_v22, %v386_v23  ;;  %v511_v30 = vrot.slane %v1512_v27, %v2005_v3  ;;  %v515_v31 = vrot.slane %v1512_v27, %v2007_v4  ;;  %v1518_v45 = vld [vmem:[%s2657_s3 + $0x1] ss:$8 sm:$0x3]  ;;  %v1517_v50 = vld [vmem:[%s2657_s3 + $0x5] ss:$8 sm:$0x3] }
  0x5f   : > { %v479_v33 = vcombine.low %v474_v25, %v478_v26  ;;  %v569_v34 = vrot.slane %v1513_v28, %v2005_v3  ;;  %v573_v35 = vrot.slane %v1513_v28, %v2007_v4  ;;  %642 = vst [vmem:[#allocation3 + $0x68] sm:$0xf0] %v2050_v32  ;;  %v606_v39 = vrot.slane %v1514_v36, %v2005_v3  ;;  %v1519_v53 = vld [vmem:[%s2657_s3 + $0x6] ss:$8 sm:$0x3]  ;;  %s2662_s12 = smov 78  }
  0x60   : > { %v516_v38 = vcombine.low %v511_v30, %v515_v31  ;;  %v610_v40 = vrot.slane %v1514_v36, %v2007_v4  ;;  %v650_v42 = vrot.slane %v1515_v37, %v2005_v3  ;;  %v654_v43 = vrot.slane %v1515_v37, %v2007_v4  ;;  %v1521_v61 = vld [vmem:[%s2657_s3 + $0x6] ss:$8 sm:$0x3]  ;;  %v1520_v62 = vld [vmem:[%s2657_s3 + $0x1] ss:$8 sm:$0x3] }
  0x61   : > { %v574_v41 = vcombine.low %v569_v34, %v573_v35  ;;  %v686_v47 = vrot.slane %v1516_v44, %v2005_v3  ;;  %v690_v48 = vrot.slane %v1516_v44, %v2007_v4  ;;  %v778_v51 = vrot.slane %v1518_v45, %v2005_v3  ;;  %v1523_v6 = vld [vmem:[%s2657_s3 + $0x6] ss:$8 sm:$0x3]  ;;  %v1522_v9 = vld [vmem:[%s2657_s3 + $0x1] ss:$8 sm:$0x3] }
  0x62   : > { %305 = vrot.lane.b32.xlu0 %v304_v21, %s1800_s30  ;;  %425 = vrot.lane.b32.xlu1 %v424_v24, %s1801_s8  ;;  %v611_v46 = vcombine.low %v606_v39, %v610_v40  ;;  %v655_v49 = vcombine.low %v650_v42, %v654_v43  ;;  %v782_v52 = vrot.slane %v1518_v45, %v2007_v4  ;;  %s2664_s13 = smov 114   ;;  %v1123_v13 = vld [vmem:[%s2657_s3] ss:$8 sm:$0x3]  ;;  %s1813_s11 = smov 14   ;;  %vm323_vm0 = vcmask 736256  }
  0x63   : > { %v2091_v54 = vcombine.low %v2050_v32, %v2050_v32  ;;  %v691_v55 = vcombine.low %v686_v47, %v690_v48  ;;  %v740_v56 = vrot.slane %v1517_v50, %v2005_v3  ;;  %v744_v57 = vrot.slane %v1517_v50, %v2007_v4  ;;  %v1040_v17 = vld [vmem:[%s2657_s3] ss:$8 sm:$0x3]  ;;  %v1525_v21 = vld [vmem:[%s2657_s3 + $0x7] ss:$8 sm:$0x3] }
  0x64   : > { %v783_v58 = vcombine.low %v778_v51, %v782_v52  ;;  %v835_v59 = vrot.slane %v1519_v53, %v2005_v3  ;;  %v839_v60 = vrot.slane %v1519_v53, %v2007_v4  ;;  %v918_v0 = vrot.slane %v1521_v61, %v2005_v3  ;;  %v1524_v25 = vld [vmem:[%s2657_s3 + $0x7] ss:$8 sm:$0x3]  ;;  %v1201_v34 = vld [vmem:[%s2657_s3] ss:$8 sm:$0x3] }
  0x65   : > { %641 = vst [vmem:[#allocation3 + $0x60] sm:$0xf0] %v2091_v54  ;;  %v745_v63 = vcombine.low %v740_v56, %v744_v57  ;;  %v922_v2 = vrot.slane %v1521_v61, %v2007_v4  ;;  %v873_v7 = vrot.slane %v1520_v62, %v2005_v3  ;;  %v877_v8 = vrot.slane %v1520_v62, %v2007_v4  ;;  %v1652_v43 = vld [vmem:[#allocation2 + $0x14] ss:$0 sps:$4 sm:$0xff]   ;;  %v2164_v44 = vld [vmem:[#allocation2 + $0xc] sm:$0xff]  ;;  %s1816_s14 = smov 96  }
  0x66   : > { %388 = vrot.lane.b32.xlu0 %v387_v29, %s1802_s28  ;;  %480 = vrot.lane.b32.xlu1 %v479_v33, %s1803_s27  ;;  %v840_v5 = vcombine.low %v835_v59, %v839_v60  ;;  %v1009_v11 = vrot.slane %v1523_v6, %v2005_v3  ;;  %v1013_v12 = vrot.slane %v1523_v6, %v2007_v4  ;;  %v1526_v29 = vld [vmem:[%s2657_s3 + $0x7] ss:$8 sm:$0x3]  ;;  %v1654_v45 = vld [vmem:[#allocation2 + $0x18] ss:$0 sps:$4 sm:$0xff]   ;;  %s1817_s21 = smov 32  }
  0x67   : > { %v923_v10 = vcombine.low %v918_v0, %v922_v2  ;;  %v878_v14 = vcombine.low %v873_v7, %v877_v8  ;;  %v955_v15 = vrot.slane %v1522_v9, %v2005_v3  ;;  %v959_v16 = vrot.slane %v1522_v9, %v2007_v4  ;;  %v544_v47 = vld [vmem:[#allocation2 + $0x10] sm:$0xf]  ;;  %v2182_v48 = vld [vmem:[#allocation2 + $0x14] sm:$0xff]  ;;  %s1818_s9 = smov 64   ;;  %v717_v50 = vld [vmem:[#allocation2 + $0x1c] sm:$0xf] }
  0x68   : > { %v1014_v18 = vcombine.low %v1009_v11, %v1013_v12  ;;  %v1128_v19 = vrot.slane %v1123_v13, %v2005_v3  ;;  %v1132_v20 = vrot.slane %v1123_v13, %v2007_v4  ;;  %v1045_v23 = vrot.slane %v1040_v17, %v2005_v3  ;;  %v2192_v51 = vld [vmem:[#allocation2 + $0x1c] sm:$0xff]  ;;  %v292_v59 = vld [vmem:[#allocation2 + $0x14] sm:$0xf]  ;;  %v413_v61 = vld [vmem:[#allocation2 + $0x18] sm:$0xf] }
  0x69   : > { %v960_v22 = vcombine.low %v955_v15, %v959_v16  ;;  %v1049_v24 = vrot.slane %v1040_v17, %v2007_v4  ;;  %v1170_v27 = vrot.slane %v1525_v21, %v2005_v3  ;;  %v1174_v28 = vrot.slane %v1525_v21, %v2007_v4  ;;  %1240 = vst [vmem:[#allocation3 + $0x110] sm:$0xf] %v2192_v51 }
  0x6a   : > { %517 = vrot.lane.b32.xlu0 %v516_v38, %s1804_s23  ;;  %575 = vrot.lane.b32.xlu1 %v574_v41, %s1805_s25  ;;  %v1133_v26 = vcombine.low %v1128_v19, %v1132_v20  ;;  %v1091_v31 = vrot.slane %v1524_v25, %v2005_v3  ;;  %v1095_v33 = vrot.slane %v1524_v25, %v2007_v4  ;;  %vm520_vm1 = vcmask 424960   ;;  %v644_v20 = vld [vmem:[#allocation2 + $0x18] sm:$0xf] }
  0x6b   : > { %v1050_v30 = vcombine.low %v1045_v23, %v1049_v24  ;;  %v1175_v35 = vcombine.low %v1170_v27, %v1174_v28  ;;  %v1249_v36 = vrot.slane %v1526_v29, %v2005_v3  ;;  %v1253_v37 = vrot.slane %v1526_v29, %v2007_v4 }
  0x6c   : > { %v1096_v38 = vcombine.low %v1091_v31, %v1095_v33  ;;  %v1206_v39 = vrot.slane %v1201_v34, %v2005_v3  ;;  %v1210_v40 = vrot.slane %v1201_v34, %v2007_v4  ;;  %v276_v3 = vcombine.low %v2164_v44, %v2164_v44  ;;  %v2171_v4 = vld [vmem:[#allocation2 + $0x4] sm:$0xff] }
  0x6d   : > { %v1254_v41 = vcombine.low %v1249_v36, %v1253_v37  ;;  %1081 = vst [vmem:[#allocation3 + $0xe0] sm:$0xf] %v2171_v4  ;;  %vm536_vm2 = vcmask 621568   ;;  %vm346_vm3 = vcmask 998400   ;;  %vm265_vm4 = vcmask 834560  }
  0x6e   : > { %612 = vrot.lane.b32.xlu0 %v611_v46, %s1806_s5  ;;  %656 = vrot.lane.b32.xlu1 %v655_v49, %s1807_s6  ;;  %v1211_v42 = vcombine.low %v1206_v39, %v1210_v40  ;;  %v547_v46 = vcombine.high %v1797_v1, %v1797_v1  ;;  %v720_v49 = vcombine.high %v2182_v48, %v2182_v48  ;;  %vm250_vm5 = vcmask 211968  }
  0x6f   : > { %vm308_vm6 = vcmask 310272   ;;  %vm615_vm7 = vcmask 949248   ;;  %vm362_vm8 = vcmask 48128   ;;  %vm630_vm9 = vcmask 97280  }
  0x70   : > { %vm2672_vm10 = vcmask 785408   ;;  %vm460_vm11 = vcmask 261120   ;;  %vm554_vm12 = vcmask 523264   ;;  %vm2673_vm13 = vcmask 637952  }
  0x71   : > { %vm2675_vm14 = vcmask 900096   ;;  %vm2674_vm15 = vcmask 932864  }
  0x72   : > { %692 = vrot.lane.b32.xlu0 %v691_v55, %s1804_s23  ;;  %784 = vrot.lane.b32.xlu1 %v783_v58, %s2662_s12  ;;  %s2666_s12 = smov 18  }
  0x76   : > { %746 = vrot.lane.b32.xlu0 %v745_v63, %s1805_s25  ;;  %841 = vrot.lane.b32.xlu1 %v840_v5, %s2664_s13  ;;  %s2668_s13 = smov 110   ;;  %v468_v5 = vld [vmem:[#allocation2 + $0x18] sm:$0xf] }
  0x7a   : > { %924 = vrot.lane.b32.xlu1 %v923_v10, %s2666_s12  ;;  %879 = vrot.lane.b32.xlu0 %v878_v14, %s2668_s13  ;;  %s2670_s12 = smov 50   ;;  %s1815_s13 = smov 24  }
  0x7e   : > { %1015 = vrot.lane.b32.xlu1 %v1014_v18, %s2670_s12  ;;  %961 = vrot.lane.b32.xlu0 %v960_v22, %s1813_s11  ;;  %s1814_s12 = smov 104   ;;  %v600_v18 = vld [vmem:[#allocation2 + $0x14] sm:$0xf] }
  0x82   : > { %1134 = vrot.lane.b32.xlu1 %v1133_v26, %s1814_s12  ;;  %1051 = vrot.lane.b32.xlu0 %v1050_v30, %s1814_s12 }
  0x86   : > { %1176 = vrot.lane.b32.xlu1 %v1175_v35, %s1815_s13  ;;  %1097 = vrot.lane.b32.xlu0 %v1096_v38, %s1815_s13 }
  0x8a   : > { %1255 = vrot.lane.b32.xlu1 %v1254_v41, %s1815_s13  ;;  %1212 = vrot.lane.b32.xlu0 %v1211_v42, %s1814_s12 }
  0x8e   : > { %282 = vrot.lane.b32.xlu1 %v1652_v43, %s1816_s14  ;;  %280 = vrot.lane.b32.xlu0 %v2164_v44, %s1816_s14 }
  0x92   : > { %278 = vrot.lane.b32.xlu1 %v276_v3, %s1816_s14  ;;  %456 = vrot.lane.b32.xlu0 %v2050_v32, %s1817_s21 }
  0x96   : > { %458 = vrot.lane.b32.xlu1 %v1654_v45, %s1817_s21  ;;  %454 = vrot.lane.b32.xlu0 %v2091_v54, %s1817_s21  ;;  %v234_v54 = vld [vmem:[#allocation2 + $0x14] sm:$0xf] }
  0x9a   : > { %550 = vrot.lane.b32.xlu1 %v547_v46, %s1818_s9  ;;  %552 = vrot.lane.b32.xlu0 %v544_v47, %s1818_s9  ;;  %v331_v47 = vld [vmem:[#allocation2 + $0x14] sm:$0xf] }
  0x9e   : > { %548 = vrot.lane.b32.xlu1 %v1797_v1, %s1818_s9  ;;  %723 = vrot.lane.b32.xlu0 %v720_v49, %s1818_s9 }
  0xa2   : > { %725 = vrot.lane.b32.xlu1 %v717_v50, %s1818_s9 }
  0xd0   : > { %v2195_v52 = vpop.permute.xlu0 %247  ;;  %v2197_v53 = vpop.permute.xlu1 %343 }
  0xd1   : > { %v249_v55 = vrot.slane %v2195_v52, 4  ;;  %v345_v24 = vrot.slane %v2197_v53, 4 }
  0xd3   : > { %v255_v56 = vmul.f32 %v249_v55, %v234_v54  ;;  %v347_v31 = vsel %vm346_vm3, %v345_v24, %v2197_v53  ;;  %v251_v39 = vsel %vm250_vm5, %v249_v55, %v2195_v52  ;;  %v371_v52 = vcombine.high %v2050_v32, %v2050_v32 }
  0xd4   : > { %v2200_v57 = vpop.permute.xlu0 %305  ;;  %v426_v58 = vpop.permute.xlu1 %425  ;;  %v350_v37 = vmul.f32 %v347_v31, %v2164_v44  ;;  %v2278_v43 = vmul.f32 %v2164_v44, %v251_v39  ;;  %v351_v55 = vmul.f32 %v345_v24, %v331_v47  ;;  %v734_v39 = vld [vmem:[#allocation2 + $0x1c] sm:$0xf] }
  0xd5   : > { %v307_v60 = vrot.slane %v2200_v57, 4  ;;  %263 = vrot.lane.b32.xlu1 %v255_v56, %s1803_s27  ;;  %v427_v62 = vrot.slane %v426_v58, 4  ;;  %374 = vst [vmem:[#allocation3 + $0x28] sm:$0xf] %v371_v52 }
  0xd7   : > { %v313_v63 = vmul.f32 %v307_v60, %v292_v59  ;;  %v432_v7 = vmul.f32 %v427_v62, %v413_v61  ;;  %v428_v9 = vsel %vm323_vm0, %v427_v62, %v426_v58  ;;  %v309_v3 = vsel %vm308_vm6, %v307_v60, %v2200_v57  ;;  %v376_v57 = vld [vmem:[#allocation2 + $0x18] sm:$0xf] }
  0xd8   : > { %v2206_v0 = vpop.permute.xlu0 %388  ;;  %v481_v2 = vpop.permute.xlu1 %480  ;;  %v2218_v13 = vmul.f32 %v428_v9, %v2050_v32  ;;  %v2298_v54 = vmul.f32 %v309_v3, %v2164_v44  ;;  %v355_v60 = vcombine.low %v351_v55, %v351_v55  ;;  %v562_v9 = vld [vmem:[#allocation2 + $0x10] sm:$0xf] }
  0xd9   : > { %321 = vrot.lane.b32.xlu1 %v313_v63, %s1801_s8  ;;  %v482_v6 = vrot.slane %v481_v2, 4  ;;  %v390_v45 = vrot.slane %v2206_v0, 4 }
  0xdb   : > { %v487_v8 = vmul.f32 %v482_v6, %v468_v5  ;;  %v483_v33 = vsel %vm265_vm4, %v482_v6, %v481_v2  ;;  %v391_v56 = vsel %vm362_vm8, %v390_v45, %v2206_v0  ;;  %v395_v62 = vmul.f32 %v390_v45, %v376_v57  ;;  %v504_v0 = vld [vmem:[#allocation2 + $0x10] sm:$0xf] }
  0xdc   : > { %v2210_v10 = vpop.permute.xlu0 %517  ;;  %v2212_v11 = vpop.permute.xlu1 %575  ;;  %v2263_v38 = vmul.f32 %v483_v33, %v2050_v32  ;;  %v2310_v61 = vmul.f32 %v391_v56, %v2050_v32  ;;  %v258_v45 = vcombine.high %v2278_v43, %v2278_v43  ;;  %v316_v56 = vcombine.high %v2298_v54, %v2298_v54 }
  0xdd   : > { %v519_v12 = vrot.slane %v2210_v10, 4  ;;  %440 = vrot.lane.b32.xlu1 %v432_v7, %s1800_s30  ;;  %495 = vrot.lane.b32.xlu0 %v487_v8, %s1798_s7  ;;  %v577_v15 = vrot.slane %v2212_v11, 4  ;;  %v399_v6 = vcombine.low %v395_v62, %v395_v62 }
  0xdf   : > { %v521_v14 = vsel %vm520_vm1, %v519_v12, %v2210_v10  ;;  %v578_v25 = vsel %vm536_vm2, %v577_v15, %v2212_v11  ;;  %v525_v8 = vmul.f32 %v519_v12, %v504_v0  ;;  %v490_v12 = vcombine.high %v2263_v38, %v2263_v38 }
  0xe0   : > { %v613_v16 = vpop.permute.xlu0 %612  ;;  %v2225_v17 = vpop.permute.xlu1 %656  ;;  %v2230_v23 = vmul.f32 0.0, %v521_v14  ;;  %v2245_v30 = vmul.f32 0.0, %v578_v25 }
  0xe1   : > { %v614_v19 = vrot.slane %v613_v16, 4  ;;  %436 = vrot.lane.b32.xlu1 %v2218_v13, %s1800_s30  ;;  %v658_v21 = vrot.slane %v2225_v17, 4 }
  0xe3   : > { %v620_v22 = vmul.f32 %v614_v19, %v600_v18  ;;  %v663_v28 = vmul.f32 %v658_v21, %v644_v20  ;;  %v616_v46 = vsel %vm615_vm7, %v614_v19, %v613_v16  ;;  %v659_v63 = vsel %vm630_vm9, %v658_v21, %v2225_v17  ;;  %v680_v20 = vld [vmem:[#allocation2 + $0x1c] sm:$0xf] }
  0xe4   : > { %v2237_v26 = vpop.permute.xlu0 %692  ;;  %v2239_v27 = vpop.permute.xlu1 %784  ;;  %v619_v53 = vmul.f32 %v616_v46, %v2164_v44  ;;  %v662_v7 = vmul.f32 %v659_v63, %v2050_v32  ;;  %v354_v17 = vcombine.low %v350_v37, %v350_v37  ;;  %v529_v18 = vcombine.low %v525_v8, %v525_v8  ;;  %v771_v63 = vld [vmem:[#allocation2 + $0xc] sm:$0xf] }
  0xe5   : > { %628 = vrot.lane.b32.xlu0 %v620_v22, %s1807_s6  ;;  %532 = vrot.lane.b32.xlu1 %v2230_v23, %s1805_s25  ;;  %v694_v29 = vrot.slane %v2237_v26, 4  ;;  %v582_v19 = vmul.f32 %v577_v15, %v562_v9  ;;  %v398_v9 = vcombine.low %v2310_v61, %v2310_v61 }
  0xe6   : > { %v623_v31 = vcombine.high %v619_v53, %v619_v53  ;;  %v666_v3 = vcombine.high %v662_v7, %v662_v7 }
  0xe7   : > { %v695_v36 = vsel %vm520_vm1, %v694_v29, %v2237_v26  ;;  %v586_v24 = vcombine.low %v582_v19, %v582_v19  ;;  %v699_v25 = vmul.f32 %v694_v29, %v680_v20  ;;  %v585_v19 = vcombine.low %v2245_v30, %v2245_v30 }
  0xe8   : > { %v2250_v34 = vpop.permute.xlu0 %746  ;;  %v2252_v35 = vpop.permute.xlu1 %841  ;;  %v2275_v42 = vmul.f32 %v2182_v48, %v695_v36 }
  0xe9   : > { %671 = vrot.lane.b32.xlu0 %v663_v28, %s1806_s5  ;;  %589 = vrot.lane.b32.xlu1 %v2245_v30, %s1804_s23  ;;  %v703_v33 = vcombine.low %v699_v25, %v699_v25  ;;  %v748_v26 = vrot.slane %v2250_v34, 4  ;;  %v843_v20 = vrot.slane %v2252_v35, 4  ;;  %v912_v25 = vld [vmem:[#allocation2 + $0x18] sm:$0xf] }
  0xea   : > { %v702_v55 = vcombine.low %v2275_v42, %v2275_v42 }
  0xeb   : > { %v753_v52 = vmul.f32 %v748_v26, %v734_v39  ;;  %v749_v8 = vsel %vm536_vm2, %v748_v26, %v2250_v34  ;;  %v845_v26 = vsel %vm2674_vm15, %v843_v20, %v2252_v35  ;;  %vm2676_vm15 = vcmask 146432  }
  0xec   : > { %v2267_v40 = vpop.permute.xlu1 %924  ;;  %v2269_v41 = vpop.permute.xlu0 %879 }
  0xed   : > { %358 = vrot.lane.b32.xlu0 %v350_v37, %s1802_s28  ;;  %491 = vrot.lane.b32.xlu1 %v2263_v38, %s1798_s7  ;;  %v926_v30 = vrot.slane %v2267_v40, 4 }
  0xf0   : > { %v2286_v49 = vpop.permute.xlu1 %1015  ;;  %v2288_v50 = vpop.permute.xlu0 %961 }
  0xf1   : > { %706 = vrot.lane.b32.xlu1 %v2275_v42, %s1805_s25  ;;  %259 = vrot.lane.b32.xlu0 %v2278_v43, %s1803_s27  ;;  %v786_v43 = vrot.slane %v2239_v27, 4  ;;  %v435_v42 = vcombine.high %v2218_v13, %v2218_v13  ;;  %v1657_v13 = vld [vmem:[#allocation2 + $0xc] ss:$0 sps:$4 sm:$0xff]   ;;  %v1017_v35 = vrot.slane %v2286_v49, 4 }
  0xf4   : > { %v2302_v58 = vpop.permute.xlu1 %1134  ;;  %v2304_v59 = vpop.permute.xlu0 %1051 }
  0xf5   : > { %624 = vrot.lane.b32.xlu1 %v619_v53, %s1807_s6  ;;  %317 = vrot.lane.b32.xlu0 %v2298_v54, %s1801_s8  ;;  %v792_v54 = vmul.f32 %v786_v43, %v771_v63  ;;  %v949_v63 = vld [vmem:[#allocation2 + $0x20] sm:$0xf] }
  0xf8   : > { %v2314_v2 = vpop.permute.xlu1 %1176  ;;  %v2316_v5 = vpop.permute.xlu0 %1097 }
  0xf9   : > { %360 = vrot.lane.b32.xlu1 %v355_v60, %s1802_s28  ;;  %402 = vrot.lane.b32.xlu0 %v2310_v61, %s1799_s10  ;;  %v757_v60 = vcombine.low %v753_v52, %v753_v52  ;;  %v788_v61 = vsel %vm2673_vm13, %v786_v43, %v2239_v27  ;;  %vm802_vm13 = vcmask 408576   ;;  %v927_v52 = vsel %vm2676_vm15, %v926_v30, %v2267_v40 }
  0xfa   : > { %vm1070_vm15 = vcmask 195584  }
  0xfc   : > { %v2324_v14 = vpop.permute.xlu1 %1255  ;;  %v2326_v16 = vpop.permute.xlu0 %1212 }
  0xfd   : > { %404 = vrot.lane.b32.xlu1 %v399_v6, %s1799_s10  ;;  %667 = vrot.lane.b32.xlu0 %v662_v7, %s1806_s5 }
 0x100   : > { %v283_v21 = vpop.permute.xlu1 %282  ;;  %v281_v22 = vpop.permute.xlu0 %280 }
 0x101   : > { %356 = vrot.lane.b32.xlu1 %v354_v17, %s1802_s28  ;;  %534 = vrot.lane.b32.xlu0 %v529_v18, %s1805_s25  ;;  %v286_v10 = vsel %vm2672_vm10, %v281_v22, %v283_v21  ;;  %v752_v17 = vmul.f32 %v749_v8, %v2182_v48  ;;  %v528_v18 = vcombine.low %v2230_v23, %v2230_v23  ;;  %v881_v21 = vrot.slane %v2269_v41, 4  ;;  %s2696_s28 = smov 78  }
 0x102   : > { %290 = vst [vmem:[#allocation3 + $0x8] sm:$0xf0] %v286_v10  ;;  %v813_v23 = vcombine.low %v2171_v4, %v2171_v4  ;;  %v867_v10 = vld [vmem:[#allocation2 + $0x14] sm:$0xf] }
 0x103   : > { %v756_v34 = vcombine.low %v752_v17, %v752_v17 }
 0x104   : > { %v279_v28 = vpop.permute.xlu1 %278  ;;  %v457_v11 = vpop.permute.xlu0 %456 }
 0x105   : > { %493 = vrot.lane.b32.xlu1 %v490_v12, %s1798_s7  ;;  %591 = vrot.lane.b32.xlu0 %v586_v24, %s1804_s23  ;;  %v285_v15 = vsel %vm2672_vm10, %v279_v28, %v281_v22  ;;  %s2692_s7 = smov 50   ;;  %v828_v22 = vld [vmem:[#allocation2 + $0xc] sm:$0xf]  ;;  %v791_v12 = vmul.f32 %v788_v61, %v2171_v4  ;;  %v887_v24 = vmul.f32 %v881_v21, %v867_v10  ;;  %vm859_vm10 = vcmask 113664  }
 0x106   : > { %289 = vst [vmem:[#allocation3] sm:$0xf0] %v285_v15  ;;  %v849_v27 = vmul.f32 %v843_v20, %v828_v22  ;;  %v931_v15 = vmul.f32 %v926_v30, %v912_v25  ;;  %v988_v25 = vcombine.low %v1797_v1, %v1797_v1 }
 0x107   : > { %v795_v28 = vcombine.high %v791_v12, %v791_v12 }
 0x108   : > { %v459_v36 = vpop.permute.xlu1 %458  ;;  %v455_v37 = vpop.permute.xlu0 %454 }
 0x109   : > { %626 = vrot.lane.b32.xlu1 %v623_v31, %s1807_s6  ;;  %708 = vrot.lane.b32.xlu0 %v703_v33, %s1805_s25  ;;  %v462_v29 = vsel %vm460_vm11, %v457_v11, %v459_v36  ;;  %v461_v38 = vsel %vm460_vm11, %v455_v37, %v457_v11  ;;  %v891_v11 = vcombine.low %v887_v24, %v887_v24  ;;  %v963_v33 = vrot.slane %v2288_v50, 4 }
 0x10a   : > { %466 = vst [vmem:[#allocation3 + $0x38] sm:$0xf0] %v462_v29  ;;  %465 = vst [vmem:[#allocation3 + $0x30] sm:$0xf0] %v461_v38  ;;  %v883_v31 = vsel %vm2675_vm14, %v881_v21, %v2269_v41  ;;  %v935_v36 = vcombine.low %v931_v15, %v931_v15  ;;  %v2409_v41 = vld [vmem:[#allocation2 + $0x10] sm:$0xff]  ;;  %v848_v38 = vmul.f32 %v845_v26, %v2171_v4  ;;  %vm1054_vm14 = vcmask 850944  }
 0x10b   : > { %v886_v37 = vmul.f32 %v883_v31, %v2164_v44  ;;  %v964_v29 = vsel %vm859_vm10, %v963_v33, %v2288_v50  ;;  %909 = vst [vmem:[#allocation3 + $0xb0] sm:$0xf] %v2409_v41  ;;  %1162 = vst [vmem:[#allocation3 + $0xf8] sm:$0xf0] %v2409_v41  ;;  %v1214_v24 = vrot.slane %v2326_v16, 4  ;;  %v1257_v15 = vrot.slane %v2324_v14, 4 }
 0x10c   : > { %v551_v46 = vpop.permute.xlu1 %550  ;;  %v553_v47 = vpop.permute.xlu0 %552  ;;  %v967_v39 = vmul.f32 0.0, %v964_v29  ;;  %v852_v50 = vcombine.high %v848_v38, %v848_v38  ;;  %v1084_v31 = vld [vmem:[#allocation2 + $0xc] sm:$0xf]  ;;  %v1159_v29 = vcombine.low %v2409_v41, %v2409_v41 }
 0x10d   : > { %669 = vrot.lane.b32.xlu1 %v666_v3, %s1806_s5  ;;  %261 = vrot.lane.b32.xlu0 %v258_v45, %s1803_s27  ;;  %v556_v53 = vsel %vm554_vm12, %v551_v46, %v553_v47  ;;  %v890_v3 = vcombine.low %v886_v37, %v886_v37  ;;  %v907_v45 = vcombine.high %v2409_v41, %v2409_v41  ;;  %s1534_s5 = sshll.u32 %s1867_s19, 8 }
 0x10e   : > { %560 = vst [vmem:[#allocation3 + $0x58] sm:$0xf] %v556_v53  ;;  %v1053_v53 = vrot.slane %v2304_v59, 4  ;;  %1161 = vst [vmem:[#allocation3 + $0xf0] sm:$0xf0] %v1159_v29 }
 0x10f   : > { %910 = vst [vmem:[#allocation3 + $0xb8] sm:$0xf] %v907_v45 }
 0x110   : > { %v549_v57 = vpop.permute.xlu1 %548  ;;  %v2360_v0 = vpop.permute.xlu0 %723 }
 0x111   : > { %704 = vrot.lane.b32.xlu1 %v702_v55, %s1805_s25  ;;  %319 = vrot.lane.b32.xlu0 %v316_v56, %s1801_s8  ;;  %v555_v62 = vsel %vm554_vm12, %v549_v57, %v551_v46  ;;  %v1018_v46 = vsel %vm802_vm13, %v1017_v35, %v2286_v49  ;;  %s2695_s8 = smov 114   ;;  %v930_v49 = vmul.f32 %v927_v52, %v2050_v32 }
 0x112   : > { %559 = vst [vmem:[#allocation3 + $0x50] sm:$0xf] %v555_v62  ;;  %v1021_v47 = vmul.f32 0.0, %v1018_v46  ;;  %v1055_v56 = vsel %vm1054_vm14, %v1053_v53, %v2304_v59  ;;  %v1099_v62 = vrot.slane %v2316_v5, 4  ;;  %v1238_v52 = vcombine.high %v2192_v51, %v2192_v51 }
 0x113   : > { %v1058_v57 = vmul.f32 0.0, %v1055_v56  ;;  %v934_v43 = vcombine.low %v930_v49, %v930_v49 }
 0x114   : > { %v726_v6 = vpop.permute.xlu1 %725  ;;  %v1025_v55 = vcombine.high %v1021_v47, %v1021_v47  ;;  %1241 = vst [vmem:[#allocation3 + $0x118] sm:$0xf] %v1238_v52 }
 0x115   : > { %762 = vrot.lane.b32.xlu1 %v757_v60, %s1804_s23  ;;  %438 = vrot.lane.b32.xlu0 %v435_v42, %s1800_s30  ;;  %v728_v7 = vsel %vm554_vm12, %v2360_v0, %v726_v6  ;;  %s2694_s30 = smov 110   ;;  %v1136_v60 = vrot.slane %v2302_v58, 4  ;;  %v968_v42 = vmul.f32 %v963_v33, %v949_v63  ;;  %v1104_v33 = vmul.f32 %v1099_v62, %v1084_v31 }
 0x116   : > { %732 = vst [vmem:[#allocation3 + $0x88] sm:$0xf] %v728_v7  ;;  %v1659_v7 = vld [vmem:[#allocation2 + $0x20] ss:$0 sps:$4 sm:$0xff]  }
 0x117   : > { %v1137_v6 = vsel %vm1054_vm14, %v1136_v60, %v2302_v58 }
 0x118   : > { %v2453_v8 = vmul.f32 %v1137_v6, %v2164_v44 }
 0x119   : > { %800 = vrot.lane.b32.xlu1 %v792_v54, %s2692_s7  ;;  %400 = vrot.lane.b32.xlu0 %v398_v9, %s1799_s10  ;;  %s2693_s10 = smov 18   ;;  %v1100_v54 = vsel %vm1070_vm15, %v1099_v62, %v2316_v5 }
 0x11a   : > { %v1103_v9 = vmul.f32 %v1100_v54, %v2171_v4  ;;  %v1144_v61 = vcombine.high %v2453_v8, %v2453_v8 }
 0x11c   : > { %v1107_v22 = vcombine.low %v1103_v9, %v1103_v9 }
 0x11d   : > { %819 = vrot.lane.b32.xlu1 %v1657_v13, %s1817_s21  ;;  %530 = vrot.lane.b32.xlu0 %v528_v18, %s1805_s25  ;;  %v1003_v13 = vld [vmem:[#allocation2 + $0x20] sm:$0xf]  ;;  %v1178_v18 = vrot.slane %v2314_v2, 4  ;;  %s1505_s25 = sshll.u32 %s1987_s29, 4 }
 0x11e   : > { %s226_s6 = scalar_lea.vmem [#allocation9], %s1505_s25 }
 0x121   : > { %758 = vrot.lane.b32.xlu1 %v756_v34, %s1804_s23  ;;  %587 = vrot.lane.b32.xlu0 %v585_v19, %s1804_s23  ;;  %v1039_v34 = vld [vmem:[#allocation2 + $0x8] sm:$0xf]  ;;  %v1022_v19 = vmul.f32 %v1017_v35, %v1003_v13  ;;  %v1122_v35 = vld [vmem:[#allocation2 + $0x14] sm:$0xf] }
 0x122   : > { %v1059_v44 = vmul.f32 %v1053_v53, %v1039_v34  ;;  %v1164_v53 = vld [vmem:[#allocation2 + $0x18] sm:$0xf] }
 0x123   : > { %v1183_v58 = vmul.f32 %v1178_v18, %v1164_v53 }
 0x124   : > { %v1063_v30 = vcombine.low %v1059_v44, %v1059_v44 }
 0x125   : > { %760 = vrot.lane.b32.xlu0 %v752_v17, %s1804_s23  ;;  %815 = vrot.lane.b32.xlu1 %v813_v23, %s1817_s21  ;;  %v1179_v23 = vsel %vm1070_vm15, %v1178_v18, %v2314_v2 }
 0x126   : > { %v1182_v21 = vmul.f32 %v1179_v23, %v2050_v32  ;;  %v1280_v23 = vld [vmem:[#allocation7 + $0x8] sm:$0xff] }
 0x128   : > { %v1186_v32 = vcombine.high %v1182_v21, %v1182_v21 }
 0x129   : > { %857 = vrot.lane.b32.xlu1 %v849_v27, %s1813_s11  ;;  %798 = vrot.lane.b32.xlu0 %v795_v28, %s2692_s7  ;;  %v1079_v27 = vcombine.high %v2171_v4, %v2171_v4 }
 0x12b   : > { %1082 = vst [vmem:[#allocation3 + $0xe8] sm:$0xf] %v1079_v27 }
 0x12d   : > { %896 = vrot.lane.b32.xlu1 %v891_v11, %s2693_s10  ;;  %817 = vrot.lane.b32.xlu0 %v2171_v4, %s1817_s21  ;;  %v1215_v4 = vsel %vm1054_vm14, %v1214_v24, %v2326_v16  ;;  %s1401_s21 = scalar_lea.sflag [#allocation6], %s1987_s29 }
 0x131   : > { %940 = vrot.lane.b32.xlu1 %v935_v36, %s2694_s30  ;;  %721 = vrot.lane.b32.xlu0 %v2182_v48, %s1818_s9  ;;  %v971_v48 = vcombine.high %v967_v39, %v967_v39  ;;  %v2494_v36 = vmul.f32 0.0, %v1215_v4  ;;  %s1820_s9 = smov [#allocation9]  }
 0x135   : > { %892 = vrot.lane.b32.xlu1 %v890_v3, %s2693_s10  ;;  %796 = vrot.lane.b32.xlu0 %v791_v12, %s2692_s7  ;;  %s1727_s7 = sshll.u32 %s1820_s9, 4  ;;  %s1728_s7 = int_to_ptr.vmem [resolvable:$false] %s1727_s7 }
 0x139   : > { %974 = vrot.lane.b32.xlu1 %v971_v48, %s2695_s8  ;;  %855 = vrot.lane.b32.xlu0 %v852_v50, %s1813_s11 }
 0x13d   : > { %992 = vrot.lane.b32.xlu1 %v1797_v1, %s1816_s14  ;;  %894 = vrot.lane.b32.xlu0 %v886_v37, %s2693_s10  ;;  %v1062_v1 = vcombine.low %v1058_v57, %v1058_v57  ;;  %s1729_s10 = scalar_lea.vmem %s1728_s7, 512 }
 0x141   : > { %1028 = vrot.lane.b32.xlu1 %v1025_v55, %s2696_s28  ;;  %938 = vrot.lane.b32.xlu0 %v930_v49, %s2694_s30  ;;  %v1200_v55 = vld [vmem:[#allocation2 + $0x20] sm:$0xf] }
 0x142   : > { %v1219_v56 = vmul.f32 %v1214_v24, %v1200_v55 }
 0x144   : > { %v1223_v63 = vcombine.low %v1219_v56, %v1219_v56 }
 0x145   : > { %1066 = vrot.lane.b32.xlu1 %v1058_v57, %s1815_s13  ;;  %853 = vrot.lane.b32.xlu0 %v848_v38, %s1813_s11  ;;  %v1258_v38 = vsel %vm1070_vm15, %v1257_v15, %v2324_v14  ;;  %v1141_v14 = vmul.f32 %v1136_v60, %v1122_v35  ;;  %v1243_v60 = vld [vmem:[#allocation2 + $0x24] sm:$0xf] }
 0x146   : > { %v1261_v16 = vmul.f32 %v1258_v38, %v2192_v51  ;;  %v1262_v62 = vmul.f32 %v1257_v15, %v1243_v60 }
 0x147   : > { %v2436_v40 = vpop.permute.xlu1 %263 }
 0x148   : > { %v1265_v50 = vcombine.low %v1261_v16, %v1261_v16 }
 0x149   : > { %972 = vrot.lane.b32.xlu1 %v967_v39, %s2695_s8  ;;  %936 = vrot.lane.b32.xlu0 %v934_v43, %s2694_s30  ;;  %v1108_v39 = vcombine.low %v1104_v33, %v1104_v33 }
 0x14b   : > { %v2442_v59 = vpop.permute.xlu1 %321 }
 0x14d   : > { %1026 = vrot.lane.b32.xlu1 %v1021_v47, %s2696_s28  ;;  %976 = vrot.lane.b32.xlu0 %v968_v42, %s2695_s8 }
 0x14f   : > { %v2456_v17 = vpop.permute.xlu1 %440  ;;  %v2461_v5 = vpop.permute.xlu0 %495 }
 0x151   : > { %1111 = vrot.lane.b32.xlu1 %v1103_v9, %s1814_s12  ;;  %994 = vrot.lane.b32.xlu0 %v1659_v7, %s1816_s14  ;;  %v1266_v7 = vcombine.low %v1262_v62, %v1262_v62 }
 0x153   : > { %v2465_v20 = vpop.permute.xlu1 %436 }
 0x155   : > { %1147 = vrot.lane.b32.xlu1 %v1144_v61, %s1815_s13  ;;  %1030 = vrot.lane.b32.xlu0 %v1022_v19, %s2696_s28  ;;  %v1222_v19 = vcombine.low %v2494_v36, %v2494_v36 }
 0x157   : > { %v2474_v10 = vpop.permute.xlu0 %628  ;;  %v2476_v12 = vpop.permute.xlu1 %532 }
 0x159   : > { %1109 = vrot.lane.b32.xlu1 %v1107_v22, %s1814_s12  ;;  %1068 = vrot.lane.b32.xlu0 %v1063_v30, %s1815_s13  ;;  %v1317_v30 = vld [vmem:[%s2656_s2] sm:$0xff] }
 0x15b   : > { %v2485_v28 = vpop.permute.xlu0 %671  ;;  %v2487_v11 = vpop.permute.xlu1 %589 }
 0x15d   : > { %1189 = vrot.lane.b32.xlu1 %v1186_v32, %s1814_s12  ;;  %990 = vrot.lane.b32.xlu0 %v988_v25, %s1816_s14  ;;  %v1819_v25 = vmov 0   ;;  %s2610_s14 = scalar_lea.hbm %s2658_s4, %s1534_s5 }
 0x15e   : > { %1651 = vset.pattern.permute.xlu0 %v1819_v25 }
 0x15f   : > { %v359_v37 = vpop.permute.xlu0 %358  ;;  %v492_v26 = vpop.permute.xlu1 %491 }
 0x161   : > { %1226 = vrot.lane.b32.xlu1 %v2494_v36, %s1815_s13  ;;  %1064 = vrot.lane.b32.xlu0 %v1062_v1, %s1815_s13 }
 0x163   : > { %v2504_v3 = vpop.permute.xlu1 %706  ;;  %v2506_v45 = vpop.permute.xlu0 %259 }
 0x165   : > { %1269 = vrot.lane.b32.xlu1 %v1261_v16, %s1814_s12  ;;  %1113 = vrot.lane.b32.xlu0 %v1108_v39, %s1814_s12 }
 0x167   : > { %v625_v41 = vpop.permute.xlu1 %624  ;;  %v2512_v48 = vpop.permute.xlu0 %317 }
 0x169   : > { %1187 = vrot.lane.b32.xlu1 %v1182_v21, %s1814_s12  ;;  %1149 = vrot.lane.b32.xlu0 %v1141_v14, %s1815_s13 }
 0x16b   : > { %v361_v46 = vpop.permute.xlu1 %360  ;;  %v2516_v47 = vpop.permute.xlu0 %402 }
 0x16c   : > { %v364_v49 = vsel %vm362_vm8, %v359_v37, %v361_v46 }
 0x16d   : > { %368 = vst [vmem:[#allocation3 + $0x18] sm:$0xf0] %v364_v49  ;;  %1267 = vrot.lane.b32.xlu1 %v1265_v50, %s1814_s12  ;;  %1145 = vrot.lane.b32.xlu0 %v2453_v8, %s1815_s13 }
 0x16f   : > { %v405_v57 = vpop.permute.xlu1 %404  ;;  %v668_v43 = vpop.permute.xlu0 %667 }
 0x170   : > { %v407_v51 = vsel %vm346_vm3, %v2516_v47, %v405_v57 }
 0x171   : > { %411 = vst [vmem:[#allocation3 + $0x28] sm:$0xf0] %v407_v51  ;;  %1191 = vrot.lane.b32.xlu0 %v1183_v58, %s1814_s12 }
 0x173   : > { %v357_v42 = vpop.permute.xlu1 %356  ;;  %v535_v6 = vpop.permute.xlu0 %534 }
 0x174   : > { %v363_v54 = vsel %vm362_vm8, %v357_v42, %v359_v37  ;;  %v538_v2 = vsel %vm536_vm2, %v2476_v12, %v535_v6  ;;  %vm1323_vm8 = vcmask 130048  }
 0x175   : > { %367 = vst [vmem:[#allocation3 + $0x10] sm:$0xf0] %v363_v54  ;;  %542 = vst [vmem:[#allocation3 + $0x48] sm:$0xf0] %v538_v2  ;;  %1228 = vrot.lane.b32.xlu0 %v1223_v63, %s1815_s13  ;;  %1527 = vmatprep.mubr.msk.f32.mxu0 %vm1323_vm8, %v1280_v23 }
 0x177   : > { %v494_v8 = vpop.permute.xlu1 %493  ;;  %v592_v9 = vpop.permute.xlu0 %591 }
 0x178   : > { %v497_v13 = vsel %vm250_vm5, %v492_v26, %v494_v8  ;;  %v498_v18 = vsel %vm250_vm5, %v494_v8, %v2461_v5  ;;  %v594_v34 = vsel %vm520_vm1, %v2487_v11, %v592_v9  ;;  %v1286_v50 = vld [vmem:[#allocation3 + $0x28] sm:$0xff]  ;;  %vm2702_vm5 = vcmask 637952  }
 0x179   : > { %501 = vst [vmem:[#allocation3 + $0x40] sm:$0xf] %v497_v13  ;;  %502 = vst [vmem:[#allocation3 + $0x48] sm:$0xf] %v498_v18  ;;  %1271 = vrot.lane.b32.xlu0 %v1266_v7, %s1814_s12  ;;  %s1415_s12 = sshll.u32 %s226_s6, 4  ;;  %s2612_s12 = int_to_ptr.vmem [resolvable:$true] %s1415_s12 }
 0x17a   : > { %598 = vst [vmem:[#allocation3 + $0x58] sm:$0xf0] %v594_v34  ;;  %s1723_s19 = scalar_lea.vmem %s2612_s12, 256  ;;  %p1730_p13 = scmp.lt.s32.totalorder %s2612_s12, %s1728_s7 }
 0x17b   : > { %v627_v61 = vpop.permute.xlu1 %626  ;;  %v709_v44 = vpop.permute.xlu0 %708  ;;  %p1724_p6 = scmp.ne.s32.totalorder %s2612_s12, %s1723_s19  ;;  %p1731_p0 = scmp.lt.s32.totalorder %s1729_s10, %s1723_s19 }
 0x17c   : > { %v631_v21 = vsel %vm630_vm9, %v625_v41, %v627_v61  ;;  %v632_v5 = vsel %vm630_vm9, %v627_v61, %v2474_v10  ;;  %v711_v22 = vsel %vm536_vm2, %v2504_v3, %v709_v44  ;;  %vm2705_vm9 = vmmov %vm2702_vm5 }
 0x17d   : > { %635 = vst [vmem:[#allocation3 + $0x60] sm:$0xf] %v631_v21  ;;  %636 = vst [vmem:[#allocation3 + $0x68] sm:$0xf] %v632_v5  ;;  %1224 = vrot.lane.b32.xlu0 %v1222_v19, %s1815_s13  ;;  %p1725_p9 = pnand %p1724_p6, %p1938_p8  ;;  %p1732_p5 = por %p1731_p0, %p1730_p13 }
 0x17e   : > { %715 = vst [vmem:[#allocation3 + $0x78] sm:$0xf0] %v711_v22 }
 0x17f   : > { %v670_v27 = vpop.permute.xlu1 %669  ;;  %v262_v24 = vpop.permute.xlu0 %261  ;;  %p1726_p12 = pneg %p1725_p9 }
 0x180   : > { %v673_v32 = vsel %vm615_vm7, %v668_v43, %v670_v27  ;;  %v674_v10 = vsel %vm615_vm7, %v670_v27, %v2485_v28  ;;  %v266_v15 = vsel %vm265_vm4, %v2506_v45, %v262_v24  ;;  %v267_v31 = vsel %vm265_vm4, %v262_v24, %v2436_v40  ;;  %v1290_v55 = vld [vmem:[#allocation3 + $0x48] sm:$0xff] }
 0x181   : > { %677 = vst [vmem:[#allocation3 + $0x70] sm:$0xf] %v673_v32  ;;  %678 = vst [vmem:[#allocation3 + $0x78] sm:$0xf] %v674_v10  ;;  %1320 = vperm.xlu0 %1651, %v1317_v30   ;;  %v1292_v49 = vld [vmem:[#allocation3 + $0x58] sm:$0xff]  ;;  %vm2704_vm7 = vcmask 785408   ;;  %p1733_p10 = pnand %p1732_p5, %p1726_p12 }
 0x182   : > { %270 = vst [vmem:[#allocation3] sm:$0xf] %v266_v15  ;;  %271 = vst [vmem:[#allocation3 + $0x8] sm:$0xf] %v267_v31  ;;  %v1543_v60 = vpack.c.bf16 %v1292_v49, %v1290_v55 }
 0x183   : > { %v705_v4 = vpop.permute.xlu1 %704  ;;  %v320_v1 = vpop.permute.xlu0 %319 }
 0x184   : > { %v710_v33 = vsel %vm536_vm2, %v705_v4, %v2504_v3  ;;  %v324_v36 = vsel %vm323_vm0, %v2512_v48, %v320_v1  ;;  %v325_v28 = vsel %vm323_vm0, %v320_v1, %v2442_v59  ;;  %v1294_v9 = vld [vmem:[#allocation3 + $0x68] sm:$0xff]  ;;  %v1293_v23 = vld [vmem:[#allocation3 + $0x60] sm:$0xff]  ;;  %vm2697_vm0 = vcmask 146432  }
 0x185   : > { %714 = vst [vmem:[#allocation3 + $0x70] sm:$0xf0] %v710_v33  ;;  %328 = vst [vmem:[#allocation3 + $0x10] sm:$0xf] %v324_v36 }
 0x186   : > { %329 = vst [vmem:[#allocation3 + $0x18] sm:$0xf] %v325_v28 }
 0x187   : > { %v763_v40 = vpop.permute.xlu1 %762  ;;  %v439_v37 = vpop.permute.xlu0 %438 }
 0x188   : > { %v442_v26 = vsel %vm308_vm6, %v2465_v20, %v439_v37  ;;  %v443_v29 = vsel %vm308_vm6, %v439_v37, %v2456_v17  ;;  %v1296_v54 = vld [vmem:[#allocation3 + $0x78] sm:$0xff] }
 0x189   : > { %446 = vst [vmem:[#allocation3 + $0x30] sm:$0xf] %v442_v26  ;;  %447 = vst [vmem:[#allocation3 + $0x38] sm:$0xf] %v443_v29  ;;  %v1282_v39 = vld [vmem:[#allocation3 + $0x8] sm:$0xff]  ;;  %v1281_v45 = vld [vmem:[#allocation3] sm:$0xff]  ;;  %v1547_v13 = vpack.c.bf16 %v1296_v54, %v1294_v9 }
 0x18b   : > { %v801_v38 = vpop.permute.xlu1 %800  ;;  %v401_v16 = vpop.permute.xlu0 %400 }
 0x18c   : > { %v406_v3 = vsel %vm346_vm3, %v401_v16, %v2516_v47  ;;  %v1283_v35 = vld [vmem:[#allocation3 + $0x10] sm:$0xff]  ;;  %vm2700_vm3 = vcmask 932864  }
 0x18d   : > { %v1284_v59 = vld [vmem:[#allocation3 + $0x18] sm:$0xff]  ;;  %410 = vst [vmem:[#allocation3 + $0x20] sm:$0xf0] %v406_v3  ;;  %v1537_v41 = vpack.c.bf16 %v1283_v35, %v1281_v45  ;;  %v1295_v18 = vld [vmem:[#allocation3 + $0x70] sm:$0xff]  ;;  %vm2703_vm6 = vmmov %vm2700_vm3 }
 0x18e   : > { %v1535_v14 = vpack.c.bf16 %v1284_v59, %v1282_v39  ;;  %v1549_v21 = vpack.c.bf16 %v1295_v18, %v1293_v23 }
 0x18f   : > { %v820_v48 = vpop.permute.xlu1 %819  ;;  %v531_v20 = vpop.permute.xlu0 %530 }
 0x190   : > { %1536 = vmatprep.subr.bf16.mxu0 %v1535_v14  ;;  %v537_v17 = vsel %vm536_vm2, %v531_v20, %v2476_v12  ;;  %v1288_v46 = vld [vmem:[#allocation3 + $0x38] sm:$0xff]  ;;  %v1287_v57 = vld [vmem:[#allocation3 + $0x30] sm:$0xff]  ;;  %vm2699_vm2 = vcmask 900096  }
 0x191   : > { %1538 = vmatpush1.bf16.msra.mxu0 %v1537_v41  ;;  %541 = vst [vmem:[#allocation3 + $0x40] sm:$0xf0] %v537_v17  ;;  %v1539_v52 = vpack.c.bf16 %v1288_v46, %v1286_v50  ;;  %vm2701_vm4 = vmmov %vm2699_vm2 }
 0x193   : > { %v759_v53 = vpop.permute.xlu1 %758  ;;  %1540 = vmatprep.subr.bf16.mxu0 %v1539_v52  ;;  %v588_v47 = vpop.permute.xlu0 %587 }
 0x194   : > { %v593_v58 = vsel %vm520_vm1, %v588_v47, %v2487_v11  ;;  %v1285_v56 = vld [vmem:[#allocation3 + $0x20] sm:$0xff] }
 0x195   : > { %597 = vst [vmem:[#allocation3 + $0x50] sm:$0xf0] %v593_v58  ;;  %v1541_v43 = vpack.c.bf16 %v1287_v57, %v1285_v56 }
 0x197   : > { %1542 = vmatpush1.bf16.msra.mxu0 %v1541_v43  ;;  %v761_v12 = vpop.permute.xlu0 %760  ;;  %v816_v51 = vpop.permute.xlu1 %815 }
 0x198   : > { %v764_v62 = vsel %vm520_vm1, %v759_v53, %v761_v12  ;;  %v765_v63 = vsel %vm520_vm1, %v761_v12, %v763_v40  ;;  %1544 = vmatprep.subr.bf16.mxu0 %v1543_v60  ;;  %v1289_v2 = vld [vmem:[#allocation3 + $0x40] sm:$0xff]  ;;  %vm2698_vm1 = vmmov %vm2697_vm0 }
 0x199   : > { %768 = vst [vmem:[#allocation3 + $0x80] sm:$0xf0] %v764_v62  ;;  %769 = vst [vmem:[#allocation3 + $0x88] sm:$0xf0] %v765_v63 }
 0x19b   : > { %v858_v42 = vpop.permute.xlu1 %857  ;;  %v799_v6 = vpop.permute.xlu0 %798 }
 0x19c   : > { %v804_v11 = vsel %vm802_vm13, %v799_v6, %v801_v38  ;;  %v1291_v7 = vld [vmem:[#allocation3 + $0x50] sm:$0xff] }
 0x19d   : > { %808 = vst [vmem:[#allocation3 + $0x98] sm:$0xf] %v804_v11  ;;  %v1545_v8 = vpack.c.bf16 %v1291_v7, %v1289_v2 }
 0x19f   : > { %1546 = vmatpush1.bf16.msra.mxu0 %v1545_v8  ;;  %v897_v34 = vpop.permute.xlu1 %896  ;;  %v818_v19 = vpop.permute.xlu0 %817 }
 0x1a0   : > { %v821_v61 = vsel %vm460_vm11, %v816_v51, %v818_v19  ;;  %v822_v44 = vsel %vm460_vm11, %v818_v19, %v820_v48  ;;  %1548 = vmatprep.subr.bf16.mxu0 %v1547_v13  ;;  %v1298_v32 = vld [vmem:[#allocation3 + $0x88] sm:$0xff] }
 0x1a1   : > { %825 = vst [vmem:[#allocation3 + $0x90] sm:$0xf0] %v821_v61  ;;  %826 = vst [vmem:[#allocation3 + $0x98] sm:$0xf0] %v822_v44 }
 0x1a3   : > { %1550 = vmatpush1.bf16.msra.mxu0 %v1549_v21  ;;  %v941_v5 = vpop.permute.xlu1 %940  ;;  %v722_v22 = vpop.permute.xlu0 %721 }
 0x1a4   : > { %v727_v30 = vsel %vm554_vm12, %v722_v22, %v2360_v0 }
 0x1a5   : > { %731 = vst [vmem:[#allocation3 + $0x80] sm:$0xf] %v727_v30 }
 0x1a7   : > { %v893_v27 = vpop.permute.xlu1 %892  ;;  %v797_v24 = vpop.permute.xlu0 %796 }
 0x1a8   : > { %v803_v25 = vsel %vm802_vm13, %v797_v24, %v799_v6  ;;  %v1300_v10 = vld [vmem:[#allocation3 + $0x98] sm:$0xff] }
 0x1a9   : > { %807 = vst [vmem:[#allocation3 + $0x90] sm:$0xf] %v803_v25  ;;  %v1551_v15 = vpack.c.bf16 %v1300_v10, %v1298_v32 }
 0x1ab   : > { %v975_v31 = vpop.permute.xlu1 %974  ;;  %1552 = vmatprep.subr.bf16.mxu0 %v1551_v15  ;;  %v856_v4 = vpop.permute.xlu0 %855 }
 0x1ac   : > { %v861_v1 = vsel %vm859_vm10, %v856_v4, %v858_v42  ;;  %v1297_v40 = vld [vmem:[#allocation3 + $0x80] sm:$0xff] }
 0x1ad   : > { %865 = vst [vmem:[#allocation3 + $0xa8] sm:$0xf] %v861_v1 }
 0x1af   : > { %v993_v33 = vpop.permute.xlu1 %992  ;;  %v895_v36 = vpop.permute.xlu0 %894 }
 0x1b0   : > { %v899_v28 = vsel %vm2697_vm0, %v893_v27, %v895_v36  ;;  %v900_v0 = vsel %vm2698_vm1, %v895_v36, %v897_v34  ;;  %v1299_v37 = vld [vmem:[#allocation3 + $0x90] sm:$0xff] }
 0x1b1   : > { %903 = vst [vmem:[#allocation3 + $0xa0] sm:$0xf0] %v899_v28  ;;  %904 = vst [vmem:[#allocation3 + $0xa8] sm:$0xf0] %v900_v0  ;;  %v1553_v26 = vpack.c.bf16 %v1299_v37, %v1297_v40 }
 0x1b3   : > { %v1029_v29 = vpop.permute.xlu1 %1028  ;;  %1554 = vmatpush1.bf16.msra.mxu0 %v1553_v26  ;;  %v939_v38 = vpop.permute.xlu0 %938 }
 0x1b4   : > { %v943_v16 = vsel %vm2699_vm2, %v939_v38, %v941_v5 }
 0x1b5   : > { %947 = vst [vmem:[#allocation3 + $0xb8] sm:$0xf0] %v943_v16 }
 0x1b7   : > { %v1067_v39 = vpop.permute.xlu1 %1066  ;;  %v854_v3 = vpop.permute.xlu0 %853 }
 0x1b8   : > { %v860_v59 = vsel %vm859_vm10, %v854_v3, %v856_v4  ;;  %v1302_v48 = vld [vmem:[#allocation3 + $0xa8] sm:$0xff]  ;;  %vm2706_vm10 = vmmov %vm2704_vm7 }
 0x1b9   : > { %864 = vst [vmem:[#allocation3 + $0xa0] sm:$0xf] %v860_v59 }
 0x1bb   : > { %v973_v45 = vpop.permute.xlu1 %972  ;;  %v937_v35 = vpop.permute.xlu0 %936 }
 0x1bc   : > { %v978_v14 = vsel %vm2700_vm3, %v973_v45, %v975_v31  ;;  %v942_v41 = vsel %vm2701_vm4, %v937_v35, %v939_v38  ;;  %v1304_v20 = vld [vmem:[#allocation3 + $0xb8] sm:$0xff] }
 0x1bd   : > { %982 = vst [vmem:[#allocation3 + $0xc0] sm:$0xf] %v978_v14  ;;  %946 = vst [vmem:[#allocation3 + $0xb0] sm:$0xf0] %v942_v41  ;;  %v1555_v17 = vpack.c.bf16 %v1304_v20, %v1302_v48  ;;  %v1279_v41 = vld [vmem:[#allocation7] sm:$0xff] }
 0x1bf   : > { %v1027_v50 = vpop.permute.xlu1 %1026  ;;  %1556 = vmatprep.subr.bf16.mxu0 %v1555_v17  ;;  %v977_v46 = vpop.permute.xlu0 %976 }
 0x1c0   : > { %v1032_v52 = vsel %vm2702_vm5, %v1027_v50, %v1029_v29  ;;  %v979_v53 = vsel %vm2703_vm6, %v975_v31, %v977_v46  ;;  %v1301_v58 = vld [vmem:[#allocation3 + $0xa0] sm:$0xff] }
 0x1c1   : > { %1036 = vst [vmem:[#allocation3 + $0xd0] sm:$0xf] %v1032_v52  ;;  %983 = vst [vmem:[#allocation3 + $0xc8] sm:$0xf] %v979_v53 }
 0x1c3   : > { %v1112_v47 = vpop.permute.xlu1 %1111  ;;  %v995_v55 = vpop.permute.xlu0 %994 }
 0x1c4   : > { %v997_v49 = vsel %vm2704_vm7, %v993_v33, %v995_v55  ;;  %v1303_v56 = vld [vmem:[#allocation3 + $0xb0] sm:$0xff] }
 0x1c5   : > { %1001 = vst [vmem:[#allocation3 + $0xc8] sm:$0xf0] %v997_v49  ;;  %v1557_v57 = vpack.c.bf16 %v1303_v56, %v1301_v58 }
 0x1c7   : > { %v1148_v43 = vpop.permute.xlu1 %1147  ;;  %1558 = vmatpush1.bf16.msra.mxu0 %v1557_v57  ;;  %v1031_v60 = vpop.permute.xlu0 %1030 }
 0x1c8   : > { %v1033_v12 = vsel %vm2705_vm9, %v1029_v29, %v1031_v60 }
 0x1c9   : > { %1037 = vst [vmem:[#allocation3 + $0xd8] sm:$0xf] %v1033_v12 }
 0x1cb   : > { %v1110_v51 = vpop.permute.xlu1 %1109  ;;  %v1069_v62 = vpop.permute.xlu0 %1068 }
 0x1cc   : > { %v1115_v63 = vsel %vm1054_vm14, %v1110_v51, %v1112_v47  ;;  %v1072_v42 = vsel %vm1070_vm15, %v1067_v39, %v1069_v62  ;;  %v1306_v9 = vld [vmem:[#allocation3 + $0xc8] sm:$0xff] }
 0x1cd   : > { %1119 = vst [vmem:[#allocation3 + $0xe0] sm:$0xf0] %v1115_v63  ;;  %1076 = vst [vmem:[#allocation3 + $0xd8] sm:$0xf0] %v1072_v42 }
 0x1cf   : > { %v1190_v6 = vpop.permute.xlu1 %1189  ;;  %v991_v54 = vpop.permute.xlu0 %990 }
 0x1d0   : > { %v996_v11 = vsel %vm2706_vm10, %v991_v54, %v993_v33 }
 0x1d1   : > { %1000 = vst [vmem:[#allocation3 + $0xc0] sm:$0xf0] %v996_v11 }
 0x1d3   : > { %v1227_v2 = vpop.permute.xlu1 %1226  ;;  %v1065_v7 = vpop.permute.xlu0 %1064 }
 0x1d4   : > { %v1071_v8 = vsel %vm1070_vm15, %v1065_v7, %v1067_v39  ;;  %v1308_v13 = vld [vmem:[#allocation3 + $0xd8] sm:$0xff]  ;;  %v1309_v0 = vld [vmem:[#allocation3 + $0xe0] sm:$0xff] }
 0x1d5   : > { %1075 = vst [vmem:[#allocation3 + $0xd0] sm:$0xf0] %v1071_v8  ;;  %v1559_v18 = vpack.c.bf16 %v1308_v13, %v1306_v9 }
 0x1d7   : > { %v1270_v34 = vpop.permute.xlu1 %1269  ;;  %1560 = vmatprep.subr.bf16.mxu0 %v1559_v18  ;;  %v1114_v19 = vpop.permute.xlu0 %1113 }
 0x1d8   : > { %v1116_v61 = vsel %vm1054_vm14, %v1112_v47, %v1114_v19  ;;  %v1305_v22 = vld [vmem:[#allocation3 + $0xc0] sm:$0xff] }
 0x1d9   : > { %1120 = vst [vmem:[#allocation3 + $0xe8] sm:$0xf0] %v1116_v61 }
 0x1db   : > { %v1188_v44 = vpop.permute.xlu1 %1187  ;;  %v1150_v23 = vpop.permute.xlu0 %1149 }
 0x1dc   : > { %v1193_v21 = vsel %vm1054_vm14, %v1188_v44, %v1190_v6  ;;  %v1152_v5 = vsel %vm1070_vm15, %v1148_v43, %v1150_v23  ;;  %v1307_v30 = vld [vmem:[#allocation3 + $0xd0] sm:$0xff] }
 0x1dd   : > { %1197 = vst [vmem:[#allocation3 + $0x100] sm:$0xf] %v1193_v21  ;;  %1156 = vst [vmem:[#allocation3 + $0xf8] sm:$0xf] %v1152_v5  ;;  %v1561_v27 = vpack.c.bf16 %v1307_v30, %v1305_v22 }
 0x1df   : > { %v1268_v24 = vpop.permute.xlu1 %1267  ;;  %1562 = vmatpush1.bf16.msra.mxu0 %v1561_v27  ;;  %v1146_v25 = vpop.permute.xlu0 %1145 }
 0x1e0   : > { %v1273_v32 = vsel %vm1054_vm14, %v1268_v24, %v1270_v34  ;;  %v1151_v10 = vsel %vm1070_vm15, %v1146_v25, %v1148_v43  ;;  %v1310_v4 = vld [vmem:[#allocation3 + $0xe8] sm:$0xff] }
 0x1e1   : > { %1277 = vst [vmem:[#allocation3 + $0x110] sm:$0xf0] %v1273_v32  ;;  %1155 = vst [vmem:[#allocation3 + $0xf0] sm:$0xf] %v1151_v10 }
 0x1e3   : > { %v1192_v15 = vpop.permute.xlu0 %1191 }
 0x1e4   : > { %v1194_v31 = vsel %vm1054_vm14, %v1190_v6, %v1192_v15  ;;  %v1312_v1 = vld [vmem:[#allocation3 + $0xf8] sm:$0xff] }
 0x1e5   : > { %1198 = vst [vmem:[#allocation3 + $0x108] sm:$0xf] %v1194_v31  ;;  %v1563_v33 = vpack.c.bf16 %v1312_v1, %v1310_v4 }
 0x1e7   : > { %1564 = vmatprep.subr.bf16.mxu0 %v1563_v33  ;;  %v1229_v36 = vpop.permute.xlu0 %1228 }
 0x1e8   : > { %v1231_v28 = vsel %vm1070_vm15, %v1227_v2, %v1229_v36  ;;  %v1311_v40 = vld [vmem:[#allocation3 + $0xf0] sm:$0xff] }
 0x1e9   : > { %1235 = vst [vmem:[#allocation3 + $0x108] sm:$0xf0] %v1231_v28  ;;  %v1565_v37 = vpack.c.bf16 %v1311_v40, %v1309_v0  ;;  %v1315_v35 = vld [vmem:[#allocation3 + $0x110] sm:$0xff] }
 0x1eb   : > { %1566 = vmatpush1.bf16.msra.mxu0 %v1565_v37  ;;  %v1272_v26 = vpop.permute.xlu0 %1271 }
 0x1ec   : > { %v1274_v29 = vsel %vm1054_vm14, %v1270_v34, %v1272_v26 }
 0x1ed   : > { %1278 = vst [vmem:[#allocation3 + $0x118] sm:$0xf0] %v1274_v29 }
 0x1ef   : > { %v1225_v38 = vpop.permute.xlu0 %1224 }
 0x1f0   : > { %v1230_v16 = vsel %vm1070_vm15, %v1225_v38, %v1227_v2  ;;  %v1314_v39 = vld [vmem:[#allocation3 + $0x108] sm:$0xff] }
 0x1f1   : > { %1234 = vst [vmem:[#allocation3 + $0x100] sm:$0xf0] %v1230_v16 }
 0x1f4   : > { %v1316_v3 = vld [vmem:[#allocation3 + $0x118] sm:$0xff] }
 0x1f5   : > { %v1567_v59 = vpack.c.bf16 %v1316_v3, %v1314_v39 }
 0x1f7   : > { %1568 = vmatprep.subr.bf16.mxu0 %v1567_v59 }
 0x1f8   : > { %v1313_v45 = vld [vmem:[#allocation3 + $0x100] sm:$0xff] }
 0x1f9   : > { %v1569_v14 = vpack.c.bf16 %v1315_v35, %v1313_v45 }
 0x1fb   : > { %1570 = vmatpush1.bf16.msra.mxu0 %v1569_v14 }
 0x1fe   : > { %1392 = vmatmul.mubr.f32.vlgmr.msra.gmra.mrb[0].mxu0 %v1279_v41 }
 0x200   : > { %v1321_v48 = vpop.permute.xlu0 %1320 }
 0x2d1   : > { %v1393_v20 = vpop.f32.mrb[0].mxu0 }
 0x2d2   : > { %v1394_v17 = vadd.f32 %v1393_v20, %v1321_v48  ;;  %v1395_v50 = vpop.f32.mrb[1].mxu0 }
 0x2d3   : > { %v1396_v46 = vadd.f32 %v1395_v50, %v1321_v48 }
 0x2d4   : > { %1398 = vst [vmem:[%s226_s6] sm:$0xff] %v1394_v17 }
 0x2d5   : > { %1399 = vst [vmem:[%s226_s6 + $0x8] sm:$0xff] %v1396_v46 }
 0x2d6   : > { %1736 = shalt.err (!%p1733_p10)
}
 0x2d7   : > { %s1737_s29 = scalar_lea.hbm %s2610_s14, 256  ;;  %s1741_s28 = scalar_lea.hbm %s2658_s4, 512 }
 0x2d8   : > { %p1738_p1 = scmp.ne.s32.totalorder %s2610_s14, %s1737_s29  ;;  %p1742_p3 = scmp.lt.u32.totalorder %s2610_s14, %s2658_s4 }
 0x2d9   : > { %p1743_p11 = scmp.lt.u32.totalorder %s1741_s28, %s1737_s29  ;;  %p1745_p6 = scmp.lt.u32.totalorder %s1737_s29, %s2610_s14 }
 0x2da   : > { %p1739_p2 = pnand %p1738_p1, %p1938_p8 }
 0x2db   : > { %p1744_p4 = por %p1743_p11, %p1742_p3 }
 0x2dc   : > { %p1740_p7 = pneg %p1739_p2 }
 0x2dd   : > { %p1746_p9 = por %p1745_p6, %p1744_p4 }
 0x2df   : > { %p1747_p12 = pnand %p1746_p9, %p1740_p7 }
 0x2e1   : > { %1750 = shalt.err (!%p1747_p12)
}
 0x2e2   : > { %1577 = dma.vmem_to_hbm [thread:$0]  (%p1938_p8), %s2612_s12, 256, %s2610_s14, %s1401_s21  }
 0x2e3 PF: > { %s1427_s25 = sand.u32 1, %s1781_s15   ;;  %p2707_p13 = scmp.ne.s32.totalorder %s2678_s22, 0 }
 0x2e4   : > { %p2708_p0 = scmp.ge.s32.totalorder %s1793_s18, 2  ;;  %s1428_s5 = scalar_lea.sflag [#allocation6], %s1427_s25 }
 0x2e6   : > { %p1588_p5 = pnand %p2708_p0, %p2707_p13 }
 0x2e8   : > { %1776 = dma.done.wait (!%p1588_p5), %s1428_s5, 256  }
 0x2e9   : > { %1778 = vsyncadd (!%p1588_p5), %s1428_s5, 4294967040  ;;  %p18_p10 = scmp.ge.s32.totalorder %s1894_s26, 4   ;;  %s2709_s15 = smov %s1785_s16 }
 0x2ea   : > { %s2710_s16 = smov %s1789_s17  ;;  %s2711_s17 = smov %s1930_s20 }
 0x2eb   : > { %s2712_s18 = smov %s1894_s26  ;;  %20 = sbr.rel (!%p18_p10) target bundleno = 6 (0x6), region = 92 }
 0x2f2   :  { %1433 = vsyncpa [#allocation5], 1 }
 0x2f3   :  { %1435 = vsyncpa [#allocation5 + $0x1], 1 }
 0x2f4   :  { %1436 = vsyncpa [#allocation8], 1 }
 0x2f5   :  { %1437 = vsyncpa [#allocation6], 1 }
 0x2f6   :  { %1439 = vsyncpa [#allocation6 + $0x1], 1 }

</bundles_post_ra>
